<compile_context>
chip_gen: v7x
topology: tpu7x:2x2x1
jax: 0.10.0
libtpu: 0.0.40
codegen_flags: <defaults>
</compile_context>

<pallas_src>
import jax
import jax.numpy as jnp
from jax.experimental import pallas as pl
from jax.experimental.pallas import tpu as pltpu

# ------------------------- synthetic tiny-ViT config -------------------------
IMG = 32                       # image H = W
C = 3                          # channels
PATCH = 8                      # conv1 kernel == stride
N_PATCH = (IMG // PATCH) ** 2  # 16 patches
SEQ = N_PATCH + 1              # 17 tokens (class token + patches)
TOK = 2 * SEQ                  # sketch + target tokens, flat
D = 32                         # transformer width (single synthetic head)
MLP = 4 * D                    # 128
OUT_DIM = 16                   # visual projection output dim
NUM_LAYERS = 12                # matches the 12 hooked resblocks
PATCH_DIM = C * PATCH * PATCH  # 192

NUM_AUGS = 2                   # kept for parity; views are deterministic no-ops
CLIP_CONV_LAYER = 11           # == NUM_LAYERS - 1 (loss hoisted after the loop)
CLIP_FC_LOSS_WEIGHT = 0.1

CLIP_MEAN = jnp.array([0.48145466, 0.4578275, 0.40821073], jnp.float32)
CLIP_STD = jnp.array([0.26862954, 0.26130258, 0.27577711], jnp.float32)


def _align8(n):
    return (n + 7) // 8 * 8


# Row offsets inside the packed "globals" slab (last dim = D, offsets 8-aligned)
G_WPATCH = 0
G_CLSPOS = G_WPATCH + PATCH_DIM          # 192
G_LNPRE = G_CLSPOS + _align8(TOK)        # 232
G_LNPOST = G_LNPRE + 8                   # 240
G_PROJ = G_LNPOST + 8                    # 248
G_ROWS = G_PROJ + D                      # 280


# --------------------------------- kernel ------------------------------------
def _clip_loss_kernel(patches_ref, glob_ref, wqkv_ref, wo_ref, w1_ref, w2_ref,
                      vecs32_ref, vecs128_ref, out_ref):
    """Fused CLIP visual encoder (sketch + target) + L2/Cos loss reductions."""

    def ln(z, g, b):
        # Two independent reductions (sum, sum of squares) -> shorter XLU chain
        # than mean -> (x - mu)^2 -> mean.
        inv_n = jnp.float32(1.0 / z.shape[-1])
        mu = jnp.sum(z, axis=-1, keepdims=True) * inv_n
        ms = jnp.sum(z * z, axis=-1, keepdims=True) * inv_n
        var = ms - mu * mu
        return (z - mu) * jax.lax.rsqrt(var + 1e-5) * g + b

    def mm(a, b):
        return jnp.dot(a, b, preferred_element_type=jnp.float32)

    # Cross-view attention mask: token i may only attend to its own view
    # (rows [0,SEQ) = sketch, [SEQ,TOK) = target).  Hoisted out of the loop.
    row = jax.lax.broadcasted_iota(jnp.int32, (TOK, TOK), 0)
    col = jax.lax.broadcasted_iota(jnp.int32, (TOK, TOK), 1)
    attn_bias = jnp.where((row < SEQ) == (col < SEQ),
                          jnp.float32(0.0), jnp.float32(-1e30))

    # conv1-as-matmul patch embedding on the flat token matrix.  Row 0 of each
    # view's patches is a zero patch, so cls_pos supplies the class embedding.
    w_patch = glob_ref[G_WPATCH:G_WPATCH + PATCH_DIM, :]
    cls_pos = glob_ref[G_CLSPOS:G_CLSPOS + TOK, :]
    x = mm(patches_ref[...], w_patch) + cls_pos

    ln_pre = glob_ref[G_LNPRE:G_LNPRE + 2, :]
    x = ln(x, ln_pre[0:1], ln_pre[1:2])

    def layer(l, x):
        v32 = vecs32_ref[l]            # (6, D): ln1_g, ln1_b, ln2_g, ln2_b, bo, b2
        v128 = vecs128_ref[l]          # (2, MLP): [bqkv | pad], b1

        # pre-LN self-attention; attention scale is folded into wq/bq at init.
        xn = ln(x, v32[0:1], v32[1:2])
        qkv = mm(xn, wqkv_ref[l]) + v128[0:1, 0:3 * D]      # (TOK, 3D)
        q = qkv[:, 0:D]
        k = qkv[:, D:2 * D]
        v = qkv[:, 2 * D:3 * D]
        att = jax.lax.dot_general(q, k, (((1,), (1,)), ((), ())),
                                  preferred_element_type=jnp.float32)
        att = att + attn_bias
        att = att - jnp.max(att, axis=-1, keepdims=True)
        p = jnp.exp(att)
        p = p * pl.reciprocal(jnp.sum(p, axis=-1, keepdims=True), approx=True)
        x = x + mm(mm(p, v), wo_ref[l]) + v32[4:5]

        # pre-LN MLP with QuickGELU (x * sigmoid(1.702 x), as in CLIP)
        xn2 = ln(x, v32[2:3], v32[3:4])
        h = mm(xn2, w1_ref[l]) + v128[1:2]
        h = h * jax.nn.sigmoid(1.702 * h)
        return x + mm(h, w2_ref[l]) + v32[5:6]

    x = jax.lax.fori_loop(0, NUM_LAYERS, layer, x)

    # Hooked featuremap loss (clip_conv_loss_type == 'L2') for the only layer
    # returned by CLIPConvLoss.forward (clip_conv_layer == NUM_LAYERS - 1).
    xs = x[0:SEQ, :]
    ys = x[SEQ:TOK, :]
    d = xs - ys
    l2_val = jnp.sum(d * d) * jnp.float32(1.0 / (SEQ * D))

    # CLS-token projection head + cosine fc loss (clip_fc_loss_type == 'Cos')
    ln_post = glob_ref[G_LNPOST:G_LNPOST + 2, :]
    proj = glob_ref[G_PROJ:G_PROJ + D, :]         # (D, D), zero-padded cols
    fx = mm(ln(xs[0:1, :], ln_post[0:1], ln_post[1:2]), proj)
    fy = mm(ln(ys[0:1, :], ln_post[0:1], ln_post[1:2]), proj)
    dot = jnp.sum(fx * fy)
    nx = jnp.sum(fx * fx)
    ny = jnp.sum(fy * fy)
    cos = dot * jax.lax.rsqrt(jnp.maximum(nx * ny, 1e-16))   # eps matches torch 1e-8 on norms

    out_ref[0, 0] = l2_val
    out_ref[0, 1] = jnp.float32(1.0) - cos


# ------------------------------ pallas wrapper --------------------------------
def clip_encode_and_loss(patches, params):
    """One fused pallas_call: encoder for both views + both loss reductions."""
    vmem = pl.BlockSpec(memory_space=pltpu.MemorySpace.VMEM)
    smem = pl.BlockSpec(memory_space=pltpu.MemorySpace.SMEM)
    inputs = (patches, params["glob"], params["wqkv"], params["wo"],
              params["w1"], params["w2"], params["vecs32"], params["vecs128"])
    out = pl.pallas_call(
        _clip_loss_kernel,
        out_shape=jax.ShapeDtypeStruct((1, 2), jnp.float32),
        in_specs=[vmem] * len(inputs),
        out_specs=smem,
    )(*inputs)
    return out[0, 0], out[0, 1]


# ------------------------------- JAX glue -------------------------------------
def normalize(x_nchw):
    return (x_nchw - CLIP_MEAN.reshape(1, C, 1, 1)) / CLIP_STD.reshape(1, C, 1, 1)


def extract_patch_rows(imgs):
    # NCHW -> (N*SEQ, PATCH_DIM): conv1 im2col (non-overlapping patches) plus a
    # leading zero row per image (class-token slot; its embedding is injected
    # via cls_pos inside the kernel so no in-kernel concatenate is needed).
    n = imgs.shape[0]
    g = IMG // PATCH
    x = imgs.reshape(n, C, g, PATCH, g, PATCH)
    x = jnp.transpose(x, (0, 2, 4, 1, 3, 5)).reshape(n, N_PATCH, PATCH_DIM)
    x = jnp.concatenate([jnp.zeros((n, 1, PATCH_DIM), jnp.float32), x], axis=1)
    return x.reshape(n * SEQ, PATCH_DIM)


def clip_conv_loss(sketch, target, params, mode="train"):
    """CLIPConvLoss.forward equivalent (mode='train')."""
    # TODO(synk): RandomPerspective / RandomResizedCrop are stochastic
    # torchvision geometric warps with no clean Pallas equivalent; the NUM_AUGS
    # extra views would be bitwise-identical normalized copies here, and the
    # mean of losses over identical views equals the single-view value, so one
    # view per input is encoded (sketch + target batched through one kernel).
    imgs = jnp.concatenate([normalize(sketch), normalize(target)], axis=0)
    patches = extract_patch_rows(imgs)            # (2*SEQ, PATCH_DIM)

    l2, fc = clip_encode_and_loss(patches, params)

    out = {f"clip_vit_l{CLIP_CONV_LAYER}": l2}
    if CLIP_FC_LOSS_WEIGHT:
        out["fc_vit"] = fc * CLIP_FC_LOSS_WEIGHT
    return out


def init_params(key):
    def nrm(k, shape, std=0.02):
        return std * jax.random.normal(k, shape, jnp.float32)

    keys = jax.random.split(key, 10)
    L = NUM_LAYERS
    scale = D ** -0.5

    w_patch = nrm(keys[0], (PATCH_DIM, D))
    cls = nrm(keys[1], (1, D))
    pos = nrm(keys[2], (SEQ, D))
    proj = nrm(keys[3], (D, OUT_DIM))

    # Attention scale folded into the query projection (and its bias).
    wq = nrm(keys[4], (L, D, D)) * scale
    wk = nrm(keys[5], (L, D, D))
    wv = nrm(keys[6], (L, D, D))
    wo = nrm(keys[7], (L, D, D))
    w1 = nrm(keys[8], (L, D, MLP))
    w2 = nrm(keys[9], (L, MLP, D))

    bq = jnp.zeros((L, D), jnp.float32) * scale   # scale fold (zero anyway)
    bk = jnp.zeros((L, D), jnp.float32)
    bv = jnp.zeros((L, D), jnp.float32)
    bo = jnp.zeros((L, D), jnp.float32)
    b1 = jnp.zeros((L, MLP), jnp.float32)
    b2 = jnp.zeros((L, D), jnp.float32)
    ln1_g = jnp.ones((L, D), jnp.float32)
    ln1_b = jnp.zeros((L, D), jnp.float32)
    ln2_g = jnp.ones((L, D), jnp.float32)
    ln2_b = jnp.zeros((L, D), jnp.float32)
    ln_pre = jnp.stack([jnp.ones((D,)), jnp.zeros((D,))]).astype(jnp.float32)
    ln_post = jnp.stack([jnp.ones((D,)), jnp.zeros((D,))]).astype(jnp.float32)

    # ----- packing into slabs -----
    wqkv = jnp.concatenate([wq, wk, wv], axis=-1)                 # (L, D, 3D)
    bqkv = jnp.concatenate([bq, bk, bv], axis=-1)                 # (L, 3D)
    vecs32 = jnp.stack([ln1_g, ln1_b, ln2_g, ln2_b, bo, b2], axis=1)   # (L, 6, D)
    vecs128 = jnp.stack(
        [jnp.concatenate([bqkv, jnp.zeros((L, MLP - 3 * D), jnp.float32)], axis=-1),
         b1], axis=1)                                             # (L, 2, MLP)

    cls_pos = pos + jnp.concatenate(
        [cls, jnp.zeros((SEQ - 1, D), jnp.float32)], axis=0)      # (SEQ, D)
    cls_pos_flat = jnp.tile(cls_pos, (2, 1))                      # (TOK, D)
    proj_pad = jnp.concatenate(
        [proj, jnp.zeros((D, D - OUT_DIM), jnp.float32)], axis=-1)  # (D, D)

    def pad_to(a, rows):
        return jnp.concatenate(
            [a, jnp.zeros((rows - a.shape[0], a.shape[1]), jnp.float32)], axis=0)

    glob = jnp.concatenate([
        w_patch,                                   # [G_WPATCH, +PATCH_DIM)
        pad_to(cls_pos_flat, G_LNPRE - G_CLSPOS),  # [G_CLSPOS, +TOK)
        pad_to(ln_pre, G_LNPOST - G_LNPRE),        # [G_LNPRE, +2)
        pad_to(ln_post, G_PROJ - G_LNPOST),        # [G_LNPOST, +2)
        proj_pad,                                  # [G_PROJ, +D)
    ], axis=0)
    assert glob.shape[0] == G_ROWS

    return {"glob": glob, "wqkv": wqkv, "wo": wo, "w1": w1, "w2": w2,
            "vecs32": vecs32, "vecs128": vecs128}


if __name__ == "__main__":
    key = jax.random.PRNGKey(0)
    k_sketch, k_target, k_params = jax.random.split(key, 3)
    params = init_params(k_params)

    sketch = jax.random.uniform(k_sketch, (1, C, IMG, IMG), jnp.float32)
    target = jax.random.uniform(k_target, (1, C, IMG, IMG), jnp.float32)

    loss_fn = jax.jit(clip_conv_loss)
    losses = loss_fn(sketch, target, params)
    losses = {k: jax.block_until_ready(v) for k, v in losses.items()}
    assert all(bool(jnp.isfinite(v)) for v in losses.values())
    print("KERNEL_OK")
</pallas_src>

<mosaic_0001>
module attributes {stable_mosaic.version = 11 : i64} {
  func.func @_clip_loss_kernel(%arg0: memref<34x192xf32, #tpu.memory_space<vmem>>, %arg1: memref<280x32xf32, #tpu.memory_space<vmem>>, %arg2: memref<12x32x96xf32, #tpu.memory_space<vmem>>, %arg3: memref<12x32x32xf32, #tpu.memory_space<vmem>>, %arg4: memref<12x32x128xf32, #tpu.memory_space<vmem>>, %arg5: memref<12x128x32xf32, #tpu.memory_space<vmem>>, %arg6: memref<12x6x32xf32, #tpu.memory_space<vmem>>, %arg7: memref<12x2x128xf32, #tpu.memory_space<vmem>>, %arg8: memref<1x2xf32, #tpu.memory_space<smem>>) attributes {dimension_semantics = [], scalar_prefetch = 0 : i64, scratch_operands = 0 : i64, tpu.core_type = #tpu.core_type<tc>} {
    %0 = tpu.iota {dimensions = array<i32: 0>} : vector<34x34xi32>
    %1 = tpu.iota {dimensions = array<i32: 1>} : vector<34x34xi32>
    %c17_i32 = arith.constant 17 : i32
    %2 = vector.broadcast %c17_i32 : i32 to vector<34x34xi32>
    %3 = arith.cmpi slt, %0, %2 : vector<34x34xi32>
    %c17_i32_0 = arith.constant 17 : i32
    %4 = vector.broadcast %c17_i32_0 : i32 to vector<34x34xi32>
    %5 = arith.cmpi slt, %1, %4 : vector<34x34xi32>
    %6 = arith.xori %3, %5 : vector<34x34xi1>
    %cst = arith.constant dense<true> : vector<34x34xi1>
    %7 = arith.xori %6, %cst : vector<34x34xi1>
    %cst_1 = arith.constant 0.000000e+00 : f32
    %cst_2 = arith.constant -1.000000e+30 : f32
    %8 = vector.broadcast %cst_1 : f32 to vector<34x34xf32>
    %9 = vector.broadcast %cst_2 : f32 to vector<34x34xf32>
    %10 = arith.select %7, %8, %9 : vector<34x34xi1>, vector<34x34xf32>
    %c0 = arith.constant 0 : index
    %c0_3 = arith.constant 0 : index
    %11 = vector.load %arg1[%c0, %c0_3] : memref<280x32xf32, #tpu.memory_space<vmem>>, vector<192x32xf32>
    %c192 = arith.constant 192 : index
    %c0_4 = arith.constant 0 : index
    %12 = vector.load %arg1[%c192, %c0_4] : memref<280x32xf32, #tpu.memory_space<vmem>>, vector<34x32xf32>
    %c0_5 = arith.constant 0 : index
    %c0_6 = arith.constant 0 : index
    %13 = vector.load %arg0[%c0_5, %c0_6] : memref<34x192xf32, #tpu.memory_space<vmem>>, vector<34x192xf32>
    %cst_7 = arith.constant dense<0.000000e+00> : vector<34x32xf32>
    %14 = tpu.matmul %13, %11, %cst_7 {dimension_numbers = #tpu.dot_dimension_numbers<[1], [0], [0], [1], [0, 0, 1, 1], [], []>} : vector<34x192xf32>, vector<192x32xf32>, vector<34x32xf32> -> vector<34x32xf32>
    %15 = arith.addf %14, %12 : vector<34x32xf32>
    %c232 = arith.constant 232 : index
    %c0_8 = arith.constant 0 : index
    %16 = vector.load %arg1[%c232, %c0_8] : memref<280x32xf32, #tpu.memory_space<vmem>>, vector<2x32xf32>
    %17 = vector.extract_strided_slice %16 {offsets = [0, 0], sizes = [1, 32], strides = [1, 1]} : vector<2x32xf32> to vector<1x32xf32>
    %18 = vector.extract_strided_slice %16 {offsets = [1, 0], sizes = [1, 32], strides = [1, 1]} : vector<2x32xf32> to vector<1x32xf32>
    %cst_9 = arith.constant dense<0.000000e+00> : vector<34xf32>
    %19 = vector.multi_reduction <add>, %15, %cst_9 [1] : vector<34x32xf32> to vector<34xf32>
    %20 = vector.shape_cast %19 : vector<34xf32> to vector<34x1xf32>
    %cst_10 = arith.constant 3.125000e-02 : f32
    %21 = vector.broadcast %cst_10 : f32 to vector<34x1xf32>
    %22 = arith.mulf %20, %21 : vector<34x1xf32>
    %23 = arith.mulf %15, %15 : vector<34x32xf32>
    %cst_11 = arith.constant dense<0.000000e+00> : vector<34xf32>
    %24 = vector.multi_reduction <add>, %23, %cst_11 [1] : vector<34x32xf32> to vector<34xf32>
    %25 = vector.shape_cast %24 : vector<34xf32> to vector<34x1xf32>
    %cst_12 = arith.constant 3.125000e-02 : f32
    %26 = vector.broadcast %cst_12 : f32 to vector<34x1xf32>
    %27 = arith.mulf %25, %26 : vector<34x1xf32>
    %28 = arith.mulf %22, %22 : vector<34x1xf32>
    %29 = arith.subf %27, %28 : vector<34x1xf32>
    %30 = vector.broadcast %22 : vector<34x1xf32> to vector<34x32xf32>
    %31 = arith.subf %15, %30 : vector<34x32xf32>
    %cst_13 = arith.constant 9.99999974E-6 : f32
    %32 = vector.broadcast %cst_13 : f32 to vector<34x1xf32>
    %33 = arith.addf %29, %32 : vector<34x1xf32>
    %34 = math.rsqrt %33 : vector<34x1xf32>
    %35 = vector.broadcast %34 : vector<34x1xf32> to vector<34x32xf32>
    %36 = arith.mulf %31, %35 : vector<34x32xf32>
    %37 = vector.broadcast %17 : vector<1x32xf32> to vector<34x32xf32>
    %38 = arith.mulf %36, %37 : vector<34x32xf32>
    %39 = vector.broadcast %18 : vector<1x32xf32> to vector<34x32xf32>
    %40 = arith.addf %38, %39 : vector<34x32xf32>
    %c0_i32 = arith.constant 0 : i32
    %c12_i32 = arith.constant 12 : i32
    %41 = arith.addi %c0_i32, %c12_i32 : i32
    %c1_i32 = arith.constant 1 : i32
    %42 = scf.for %arg9 = %c0_i32 to %41 step %c1_i32 iter_args(%arg10 = %40) -> (vector<34x32xf32>)  : i32 {
      %124 = arith.index_cast %arg9 : i32 to index
      %c0_39 = arith.constant 0 : index
      %c0_40 = arith.constant 0 : index
      %125 = vector.load %arg6[%124, %c0_39, %c0_40] : memref<12x6x32xf32, #tpu.memory_space<vmem>>, vector<1x6x32xf32>
      %126 = vector.shape_cast %125 : vector<1x6x32xf32> to vector<6x32xf32>
      %127 = arith.index_cast %arg9 : i32 to index
      %c0_41 = arith.constant 0 : index
      %c0_42 = arith.constant 0 : index
      %128 = vector.load %arg7[%127, %c0_41, %c0_42] : memref<12x2x128xf32, #tpu.memory_space<vmem>>, vector<1x2x128xf32>
      %129 = vector.shape_cast %128 : vector<1x2x128xf32> to vector<2x128xf32>
      %130 = vector.extract_strided_slice %126 {offsets = [0, 0], sizes = [1, 32], strides = [1, 1]} : vector<6x32xf32> to vector<1x32xf32>
      %131 = vector.extract_strided_slice %126 {offsets = [1, 0], sizes = [1, 32], strides = [1, 1]} : vector<6x32xf32> to vector<1x32xf32>
      %cst_43 = arith.constant dense<0.000000e+00> : vector<34xf32>
      %132 = vector.multi_reduction <add>, %arg10, %cst_43 [1] : vector<34x32xf32> to vector<34xf32>
      %133 = vector.shape_cast %132 : vector<34xf32> to vector<34x1xf32>
      %cst_44 = arith.constant 3.125000e-02 : f32
      %134 = vector.broadcast %cst_44 : f32 to vector<34x1xf32>
      %135 = arith.mulf %133, %134 : vector<34x1xf32>
      %136 = arith.mulf %arg10, %arg10 : vector<34x32xf32>
      %cst_45 = arith.constant dense<0.000000e+00> : vector<34xf32>
      %137 = vector.multi_reduction <add>, %136, %cst_45 [1] : vector<34x32xf32> to vector<34xf32>
      %138 = vector.shape_cast %137 : vector<34xf32> to vector<34x1xf32>
      %cst_46 = arith.constant 3.125000e-02 : f32
      %139 = vector.broadcast %cst_46 : f32 to vector<34x1xf32>
      %140 = arith.mulf %138, %139 : vector<34x1xf32>
      %141 = arith.mulf %135, %135 : vector<34x1xf32>
      %142 = arith.subf %140, %141 : vector<34x1xf32>
      %143 = vector.broadcast %135 : vector<34x1xf32> to vector<34x32xf32>
      %144 = arith.subf %arg10, %143 : vector<34x32xf32>
      %cst_47 = arith.constant 9.99999974E-6 : f32
      %145 = vector.broadcast %cst_47 : f32 to vector<34x1xf32>
      %146 = arith.addf %142, %145 : vector<34x1xf32>
      %147 = math.rsqrt %146 : vector<34x1xf32>
      %148 = vector.broadcast %147 : vector<34x1xf32> to vector<34x32xf32>
      %149 = arith.mulf %144, %148 : vector<34x32xf32>
      %150 = vector.broadcast %130 : vector<1x32xf32> to vector<34x32xf32>
      %151 = arith.mulf %149, %150 : vector<34x32xf32>
      %152 = vector.broadcast %131 : vector<1x32xf32> to vector<34x32xf32>
      %153 = arith.addf %151, %152 : vector<34x32xf32>
      %154 = arith.index_cast %arg9 : i32 to index
      %c0_48 = arith.constant 0 : index
      %c0_49 = arith.constant 0 : index
      %155 = vector.load %arg2[%154, %c0_48, %c0_49] : memref<12x32x96xf32, #tpu.memory_space<vmem>>, vector<1x32x96xf32>
      %156 = vector.shape_cast %155 : vector<1x32x96xf32> to vector<32x96xf32>
      %cst_50 = arith.constant dense<0.000000e+00> : vector<34x96xf32>
      %157 = tpu.matmul %153, %156, %cst_50 {dimension_numbers = #tpu.dot_dimension_numbers<[1], [0], [0], [1], [0, 0, 1, 1], [], []>} : vector<34x32xf32>, vector<32x96xf32>, vector<34x96xf32> -> vector<34x96xf32>
      %158 = vector.extract_strided_slice %129 {offsets = [0, 0], sizes = [1, 96], strides = [1, 1]} : vector<2x128xf32> to vector<1x96xf32>
      %159 = vector.broadcast %158 : vector<1x96xf32> to vector<34x96xf32>
      %160 = arith.addf %157, %159 : vector<34x96xf32>
      %161 = vector.extract_strided_slice %160 {offsets = [0, 0], sizes = [34, 32], strides = [1, 1]} : vector<34x96xf32> to vector<34x32xf32>
      %162 = vector.extract_strided_slice %160 {offsets = [0, 32], sizes = [34, 32], strides = [1, 1]} : vector<34x96xf32> to vector<34x32xf32>
      %163 = vector.extract_strided_slice %160 {offsets = [0, 64], sizes = [34, 32], strides = [1, 1]} : vector<34x96xf32> to vector<34x32xf32>
      %cst_51 = arith.constant dense<0.000000e+00> : vector<34x34xf32>
      %164 = tpu.matmul %161, %162, %cst_51 {dimension_numbers = #tpu.dot_dimension_numbers<[1], [1], [0], [0], [0, 0, 1, 0], [], []>} : vector<34x32xf32>, vector<34x32xf32>, vector<34x34xf32> -> vector<34x34xf32>
      %165 = arith.addf %164, %10 : vector<34x34xf32>
      %cst_52 = arith.constant dense<0xFF800000> : vector<34xf32>
      %166 = vector.multi_reduction <maximumf>, %165, %cst_52 [1] : vector<34x34xf32> to vector<34xf32>
      %167 = vector.shape_cast %166 : vector<34xf32> to vector<34x1xf32>
      %168 = vector.broadcast %167 : vector<34x1xf32> to vector<34x34xf32>
      %169 = arith.subf %165, %168 : vector<34x34xf32>
      %170 = math.exp %169 : vector<34x34xf32>
      %cst_53 = arith.constant dense<0.000000e+00> : vector<34xf32>
      %171 = vector.multi_reduction <add>, %170, %cst_53 [1] : vector<34x34xf32> to vector<34xf32>
      %172 = vector.shape_cast %171 : vector<34xf32> to vector<34x1xf32>
      %173 = tpu.reciprocal %172 {approx = true} : vector<34x1xf32> -> vector<34x1xf32>
      %174 = vector.broadcast %173 : vector<34x1xf32> to vector<34x34xf32>
      %175 = arith.mulf %170, %174 : vector<34x34xf32>
      %cst_54 = arith.constant dense<0.000000e+00> : vector<34x32xf32>
      %176 = tpu.matmul %175, %163, %cst_54 {dimension_numbers = #tpu.dot_dimension_numbers<[1], [0], [0], [1], [0, 0, 1, 1], [], []>} : vector<34x34xf32>, vector<34x32xf32>, vector<34x32xf32> -> vector<34x32xf32>
      %177 = arith.index_cast %arg9 : i32 to index
      %c0_55 = arith.constant 0 : index
      %c0_56 = arith.constant 0 : index
      %178 = vector.load %arg3[%177, %c0_55, %c0_56] : memref<12x32x32xf32, #tpu.memory_space<vmem>>, vector<1x32x32xf32>
      %179 = vector.shape_cast %178 : vector<1x32x32xf32> to vector<32x32xf32>
      %cst_57 = arith.constant dense<0.000000e+00> : vector<34x32xf32>
      %180 = tpu.matmul %176, %179, %cst_57 {dimension_numbers = #tpu.dot_dimension_numbers<[1], [0], [0], [1], [0, 0, 1, 1], [], []>} : vector<34x32xf32>, vector<32x32xf32>, vector<34x32xf32> -> vector<34x32xf32>
      %181 = arith.addf %arg10, %180 : vector<34x32xf32>
      %182 = vector.extract_strided_slice %126 {offsets = [4, 0], sizes = [1, 32], strides = [1, 1]} : vector<6x32xf32> to vector<1x32xf32>
      %183 = vector.broadcast %182 : vector<1x32xf32> to vector<34x32xf32>
      %184 = arith.addf %181, %183 : vector<34x32xf32>
      %185 = vector.extract_strided_slice %126 {offsets = [2, 0], sizes = [1, 32], strides = [1, 1]} : vector<6x32xf32> to vector<1x32xf32>
      %186 = vector.extract_strided_slice %126 {offsets = [3, 0], sizes = [1, 32], strides = [1, 1]} : vector<6x32xf32> to vector<1x32xf32>
      %cst_58 = arith.constant dense<0.000000e+00> : vector<34xf32>
      %187 = vector.multi_reduction <add>, %184, %cst_58 [1] : vector<34x32xf32> to vector<34xf32>
      %188 = vector.shape_cast %187 : vector<34xf32> to vector<34x1xf32>
      %cst_59 = arith.constant 3.125000e-02 : f32
      %189 = vector.broadcast %cst_59 : f32 to vector<34x1xf32>
      %190 = arith.mulf %188, %189 : vector<34x1xf32>
      %191 = arith.mulf %184, %184 : vector<34x32xf32>
      %cst_60 = arith.constant dense<0.000000e+00> : vector<34xf32>
      %192 = vector.multi_reduction <add>, %191, %cst_60 [1] : vector<34x32xf32> to vector<34xf32>
      %193 = vector.shape_cast %192 : vector<34xf32> to vector<34x1xf32>
      %cst_61 = arith.constant 3.125000e-02 : f32
      %194 = vector.broadcast %cst_61 : f32 to vector<34x1xf32>
      %195 = arith.mulf %193, %194 : vector<34x1xf32>
      %196 = arith.mulf %190, %190 : vector<34x1xf32>
      %197 = arith.subf %195, %196 : vector<34x1xf32>
      %198 = vector.broadcast %190 : vector<34x1xf32> to vector<34x32xf32>
      %199 = arith.subf %184, %198 : vector<34x32xf32>
      %cst_62 = arith.constant 9.99999974E-6 : f32
      %200 = vector.broadcast %cst_62 : f32 to vector<34x1xf32>
      %201 = arith.addf %197, %200 : vector<34x1xf32>
      %202 = math.rsqrt %201 : vector<34x1xf32>
      %203 = vector.broadcast %202 : vector<34x1xf32> to vector<34x32xf32>
      %204 = arith.mulf %199, %203 : vector<34x32xf32>
      %205 = vector.broadcast %185 : vector<1x32xf32> to vector<34x32xf32>
      %206 = arith.mulf %204, %205 : vector<34x32xf32>
      %207 = vector.broadcast %186 : vector<1x32xf32> to vector<34x32xf32>
      %208 = arith.addf %206, %207 : vector<34x32xf32>
      %209 = arith.index_cast %arg9 : i32 to index
      %c0_63 = arith.constant 0 : index
      %c0_64 = arith.constant 0 : index
      %210 = vector.load %arg4[%209, %c0_63, %c0_64] : memref<12x32x128xf32, #tpu.memory_space<vmem>>, vector<1x32x128xf32>
      %211 = vector.shape_cast %210 : vector<1x32x128xf32> to vector<32x128xf32>
      %cst_65 = arith.constant dense<0.000000e+00> : vector<34x128xf32>
      %212 = tpu.matmul %208, %211, %cst_65 {dimension_numbers = #tpu.dot_dimension_numbers<[1], [0], [0], [1], [0, 0, 1, 1], [], []>} : vector<34x32xf32>, vector<32x128xf32>, vector<34x128xf32> -> vector<34x128xf32>
      %213 = vector.extract_strided_slice %129 {offsets = [1, 0], sizes = [1, 128], strides = [1, 1]} : vector<2x128xf32> to vector<1x128xf32>
      %214 = vector.broadcast %213 : vector<1x128xf32> to vector<34x128xf32>
      %215 = arith.addf %212, %214 : vector<34x128xf32>
      %cst_66 = arith.constant 1.702000e+00 : f32
      %216 = vector.broadcast %cst_66 : f32 to vector<34x128xf32>
      %217 = arith.mulf %216, %215 : vector<34x128xf32>
      %218 = arith.negf %217 : vector<34x128xf32>
      %219 = math.exp %218 : vector<34x128xf32>
      %cst_67 = arith.constant 1.000000e+00 : f32
      %220 = vector.broadcast %cst_67 : f32 to vector<34x128xf32>
      %221 = arith.addf %220, %219 : vector<34x128xf32>
      %222 = arith.divf %220, %221 : vector<34x128xf32>
      %223 = arith.mulf %215, %222 : vector<34x128xf32>
      %224 = arith.index_cast %arg9 : i32 to index
      %c0_68 = arith.constant 0 : index
      %c0_69 = arith.constant 0 : index
      %225 = vector.load %arg5[%224, %c0_68, %c0_69] : memref<12x128x32xf32, #tpu.memory_space<vmem>>, vector<1x128x32xf32>
      %226 = vector.shape_cast %225 : vector<1x128x32xf32> to vector<128x32xf32>
      %cst_70 = arith.constant dense<0.000000e+00> : vector<34x32xf32>
      %227 = tpu.matmul %223, %226, %cst_70 {dimension_numbers = #tpu.dot_dimension_numbers<[1], [0], [0], [1], [0, 0, 1, 1], [], []>} : vector<34x128xf32>, vector<128x32xf32>, vector<34x32xf32> -> vector<34x32xf32>
      %228 = arith.addf %184, %227 : vector<34x32xf32>
      %229 = vector.extract_strided_slice %126 {offsets = [5, 0], sizes = [1, 32], strides = [1, 1]} : vector<6x32xf32> to vector<1x32xf32>
      %230 = vector.broadcast %229 : vector<1x32xf32> to vector<34x32xf32>
      %231 = arith.addf %228, %230 : vector<34x32xf32>
      scf.yield %231 : vector<34x32xf32>
    }
    %c12_i32_14 = arith.constant 12 : i32
    %43 = vector.extract_strided_slice %42 {offsets = [0, 0], sizes = [17, 32], strides = [1, 1]} : vector<34x32xf32> to vector<17x32xf32>
    %44 = vector.extract_strided_slice %42 {offsets = [17, 0], sizes = [17, 32], strides = [1, 1]} : vector<34x32xf32> to vector<17x32xf32>
    %45 = arith.subf %43, %44 : vector<17x32xf32>
    %46 = arith.mulf %45, %45 : vector<17x32xf32>
    %47 = vector.shape_cast %46 : vector<17x32xf32> to vector<1x17x32xf32>
    %cst_15 = arith.constant dense<0.000000e+00> : vector<1xf32>
    %48 = vector.multi_reduction <add>, %47, %cst_15 [1, 2] : vector<1x17x32xf32> to vector<1xf32>
    %49 = vector.shape_cast %48 : vector<1xf32> to vector<1x1x1xf32>
    %50 = vector.extract %49[0, 0, 0] : f32 from vector<1x1x1xf32>
    %cst_16 = arith.constant 0.0018382353 : f32
    %51 = arith.mulf %50, %cst_16 : f32
    %c240 = arith.constant 240 : index
    %c0_17 = arith.constant 0 : index
    %52 = vector.load %arg1[%c240, %c0_17] : memref<280x32xf32, #tpu.memory_space<vmem>>, vector<2x32xf32>
    %c248 = arith.constant 248 : index
    %c0_18 = arith.constant 0 : index
    %53 = vector.load %arg1[%c248, %c0_18] : memref<280x32xf32, #tpu.memory_space<vmem>>, vector<32x32xf32>
    %54 = vector.extract_strided_slice %43 {offsets = [0, 0], sizes = [1, 32], strides = [1, 1]} : vector<17x32xf32> to vector<1x32xf32>
    %55 = vector.extract_strided_slice %52 {offsets = [0, 0], sizes = [1, 32], strides = [1, 1]} : vector<2x32xf32> to vector<1x32xf32>
    %56 = vector.extract_strided_slice %52 {offsets = [1, 0], sizes = [1, 32], strides = [1, 1]} : vector<2x32xf32> to vector<1x32xf32>
    %cst_19 = arith.constant dense<0.000000e+00> : vector<1xf32>
    %57 = vector.multi_reduction <add>, %54, %cst_19 [1] : vector<1x32xf32> to vector<1xf32>
    %58 = vector.shape_cast %57 : vector<1xf32> to vector<1x1xf32>
    %cst_20 = arith.constant 3.125000e-02 : f32
    %59 = vector.broadcast %cst_20 : f32 to vector<1x1xf32>
    %60 = arith.mulf %58, %59 : vector<1x1xf32>
    %61 = arith.mulf %54, %54 : vector<1x32xf32>
    %cst_21 = arith.constant dense<0.000000e+00> : vector<1xf32>
    %62 = vector.multi_reduction <add>, %61, %cst_21 [1] : vector<1x32xf32> to vector<1xf32>
    %63 = vector.shape_cast %62 : vector<1xf32> to vector<1x1xf32>
    %cst_22 = arith.constant 3.125000e-02 : f32
    %64 = vector.broadcast %cst_22 : f32 to vector<1x1xf32>
    %65 = arith.mulf %63, %64 : vector<1x1xf32>
    %66 = arith.mulf %60, %60 : vector<1x1xf32>
    %67 = arith.subf %65, %66 : vector<1x1xf32>
    %68 = vector.broadcast %60 : vector<1x1xf32> to vector<1x32xf32>
    %69 = arith.subf %54, %68 : vector<1x32xf32>
    %cst_23 = arith.constant 9.99999974E-6 : f32
    %70 = vector.broadcast %cst_23 : f32 to vector<1x1xf32>
    %71 = arith.addf %67, %70 : vector<1x1xf32>
    %72 = math.rsqrt %71 : vector<1x1xf32>
    %73 = vector.broadcast %72 : vector<1x1xf32> to vector<1x32xf32>
    %74 = arith.mulf %69, %73 : vector<1x32xf32>
    %75 = arith.mulf %74, %55 : vector<1x32xf32>
    %76 = arith.addf %75, %56 : vector<1x32xf32>
    %cst_24 = arith.constant dense<0.000000e+00> : vector<1x32xf32>
    %77 = tpu.matmul %76, %53, %cst_24 {dimension_numbers = #tpu.dot_dimension_numbers<[1], [0], [0], [1], [0, 0, 1, 1], [], []>} : vector<1x32xf32>, vector<32x32xf32>, vector<1x32xf32> -> vector<1x32xf32>
    %78 = vector.extract_strided_slice %44 {offsets = [0, 0], sizes = [1, 32], strides = [1, 1]} : vector<17x32xf32> to vector<1x32xf32>
    %79 = vector.extract_strided_slice %52 {offsets = [0, 0], sizes = [1, 32], strides = [1, 1]} : vector<2x32xf32> to vector<1x32xf32>
    %80 = vector.extract_strided_slice %52 {offsets = [1, 0], sizes = [1, 32], strides = [1, 1]} : vector<2x32xf32> to vector<1x32xf32>
    %cst_25 = arith.constant dense<0.000000e+00> : vector<1xf32>
    %81 = vector.multi_reduction <add>, %78, %cst_25 [1] : vector<1x32xf32> to vector<1xf32>
    %82 = vector.shape_cast %81 : vector<1xf32> to vector<1x1xf32>
    %cst_26 = arith.constant 3.125000e-02 : f32
    %83 = vector.broadcast %cst_26 : f32 to vector<1x1xf32>
    %84 = arith.mulf %82, %83 : vector<1x1xf32>
    %85 = arith.mulf %78, %78 : vector<1x32xf32>
    %cst_27 = arith.constant dense<0.000000e+00> : vector<1xf32>
    %86 = vector.multi_reduction <add>, %85, %cst_27 [1] : vector<1x32xf32> to vector<1xf32>
    %87 = vector.shape_cast %86 : vector<1xf32> to vector<1x1xf32>
    %cst_28 = arith.constant 3.125000e-02 : f32
    %88 = vector.broadcast %cst_28 : f32 to vector<1x1xf32>
    %89 = arith.mulf %87, %88 : vector<1x1xf32>
    %90 = arith.mulf %84, %84 : vector<1x1xf32>
    %91 = arith.subf %89, %90 : vector<1x1xf32>
    %92 = vector.broadcast %84 : vector<1x1xf32> to vector<1x32xf32>
    %93 = arith.subf %78, %92 : vector<1x32xf32>
    %cst_29 = arith.constant 9.99999974E-6 : f32
    %94 = vector.broadcast %cst_29 : f32 to vector<1x1xf32>
    %95 = arith.addf %91, %94 : vector<1x1xf32>
    %96 = math.rsqrt %95 : vector<1x1xf32>
    %97 = vector.broadcast %96 : vector<1x1xf32> to vector<1x32xf32>
    %98 = arith.mulf %93, %97 : vector<1x32xf32>
    %99 = arith.mulf %98, %79 : vector<1x32xf32>
    %100 = arith.addf %99, %80 : vector<1x32xf32>
    %cst_30 = arith.constant dense<0.000000e+00> : vector<1x32xf32>
    %101 = tpu.matmul %100, %53, %cst_30 {dimension_numbers = #tpu.dot_dimension_numbers<[1], [0], [0], [1], [0, 0, 1, 1], [], []>} : vector<1x32xf32>, vector<32x32xf32>, vector<1x32xf32> -> vector<1x32xf32>
    %102 = arith.mulf %77, %101 : vector<1x32xf32>
    %103 = vector.shape_cast %102 : vector<1x32xf32> to vector<1x1x32xf32>
    %cst_31 = arith.constant dense<0.000000e+00> : vector<1xf32>
    %104 = vector.multi_reduction <add>, %103, %cst_31 [1, 2] : vector<1x1x32xf32> to vector<1xf32>
    %105 = vector.shape_cast %104 : vector<1xf32> to vector<1x1x1xf32>
    %106 = vector.extract %105[0, 0, 0] : f32 from vector<1x1x1xf32>
    %107 = arith.mulf %77, %77 : vector<1x32xf32>
    %108 = vector.shape_cast %107 : vector<1x32xf32> to vector<1x1x32xf32>
    %cst_32 = arith.constant dense<0.000000e+00> : vector<1xf32>
    %109 = vector.multi_reduction <add>, %108, %cst_32 [1, 2] : vector<1x1x32xf32> to vector<1xf32>
    %110 = vector.shape_cast %109 : vector<1xf32> to vector<1x1x1xf32>
    %111 = vector.extract %110[0, 0, 0] : f32 from vector<1x1x1xf32>
    %112 = arith.mulf %101, %101 : vector<1x32xf32>
    %113 = vector.shape_cast %112 : vector<1x32xf32> to vector<1x1x32xf32>
    %cst_33 = arith.constant dense<0.000000e+00> : vector<1xf32>
    %114 = vector.multi_reduction <add>, %113, %cst_33 [1, 2] : vector<1x1x32xf32> to vector<1xf32>
    %115 = vector.shape_cast %114 : vector<1xf32> to vector<1x1x1xf32>
    %116 = vector.extract %115[0, 0, 0] : f32 from vector<1x1x1xf32>
    %117 = arith.mulf %111, %116 : f32
    %cst_34 = arith.constant 1.000000e-16 : f32
    %118 = arith.maximumf %117, %cst_34 : f32
    %119 = math.rsqrt %118 : f32
    %120 = arith.mulf %106, %119 : f32
    %c0_35 = arith.constant 0 : index
    %c0_36 = arith.constant 0 : index
    %121 = memref.load %arg8[%c0_35, %c0_36] : memref<1x2xf32, #tpu.memory_space<smem>>
    memref.store %51, %arg8[%c0_35, %c0_36] : memref<1x2xf32, #tpu.memory_space<smem>>
    %cst_37 = arith.constant 1.000000e+00 : f32
    %122 = arith.subf %cst_37, %120 : f32
    %c0_38 = arith.constant 0 : index
    %c1 = arith.constant 1 : index
    %123 = memref.load %arg8[%c0_38, %c1] : memref<1x2xf32, #tpu.memory_space<smem>>
    memref.store %122, %arg8[%c0_38, %c1] : memref<1x2xf32, #tpu.memory_space<smem>>
    return
  }
}

</mosaic_0001>

<bundles_post_ra>
// kernel: clip_conv_loss.1
= control target key start
LH: loop header
LB: loop body
LE: loop exit
PB: predicated region body
PF: predicated region fallthrough
CT: control target
= control target key end

     0   :  { %13 = vsyncpa [#allocation3], 0  ;;  %v2314_v2 = vmov 0.0|0.0   ;;  %vm98_vm0 = vcmask 523264   ;;  %vm205_vm1 = vcmask 261120   ;;  %vm218_vm2 = vcmask 254976   ;;  %s2973_s0 = inlined_call_operand.vmem [shape: f32[34,192], index: 0, kind: input, shape index: {}]   ;;  %s2974_s1 = inlined_call_operand.vmem [shape: f32[280,32], index: 1, kind: input, shape index: {}]   ;;  %s2975_s2 = inlined_call_operand.vmem [shape: f32[12,32,96], index: 2, kind: input, shape index: {}]   ;;  %s2976_s3 = inlined_call_operand.vmem [shape: f32[12,32,32], index: 3, kind: input, shape index: {}]   ;;  %s2977_s4 = inlined_call_operand.vmem [shape: f32[12,32,128], index: 4, kind: input, shape index: {}]   ;;  %s2978_s5 = inlined_call_operand.vmem [shape: f32[12,128,32], index: 5, kind: input, shape index: {}]   ;;  %s2979_s6 = inlined_call_operand.vmem [shape: f32[12,6,32], index: 6, kind: input, shape index: {}]   ;;  %s2980_s7 = inlined_call_operand.vmem [shape: f32[12,2,128], index: 7, kind: input, shape index: {}]   ;;  %s2981_s8 = inlined_call_operand.vmem [shape: f32[1,2], index: 8, kind: output, shape index: {}]  }
   0x1   :  { %v59_v0 = vld [vmem:[%s2974_s1] sm:$0xff]  ;;  %v60_v1 = vld [vmem:[%s2974_s1 + $0x8] sm:$0xff]  ;;  %1952 = vmatprep.subr.bf16.mxu0 %v2314_v2  ;;  %2056 = vmatprep.subr.bf16.mxu1 %v2314_v2  ;;  %v61_v4 = vld [vmem:[%s2974_s1 + $0x10] sm:$0xff]  ;;  %vm2315_vm4 = vmmov 1   ;;  %s2587_s18 = smov 0  }
   0x2   :  { %v1953_v3 = vpack.c.bf16 %v60_v1, %v59_v0  ;;  %v62_v5 = vld [vmem:[%s2974_s1 + $0x18] sm:$0xff]  ;;  %v63_v7 = vld [vmem:[%s2974_s1 + $0x20] sm:$0xff]  ;;  %v64_v8 = vld [vmem:[%s2974_s1 + $0x28] sm:$0xff] }
   0x3   :  { %v1956_v6 = vpack.c.bf16 %v62_v5, %v61_v4  ;;  %v1959_v9 = vpack.c.bf16 %v64_v8, %v63_v7  ;;  %v65_v10 = vld [vmem:[%s2974_s1 + $0x30] sm:$0xff]  ;;  %v66_v11 = vld [vmem:[%s2974_s1 + $0x38] sm:$0xff]  ;;  %v89_v12 = vld [vmem:[%s2973_s0 + $0x8] sm:$0xff] }
   0x4   :  { %1954 = vmatpush1.bf16.msra.mxu0 %v1953_v3  ;;  %2068 = vmatpush1.bf16.msra.mxu1 %v1953_v3  ;;  %v95_v13 = vld [vmem:[%s2973_s0 + $0x38] sm:$0xff]  ;;  %v1962_v14 = vpack.c.bf16 %v66_v11, %v65_v10  ;;  %v67_v15 = vld [vmem:[%s2974_s1 + $0x40] sm:$0xff]  ;;  %v68_v16 = vld [vmem:[%s2974_s1 + $0x48] sm:$0xff] }
   0x5   :  { %1955 = vmatprep.subr.bf16.mxu0 %v2314_v2  ;;  %2057 = vmatprep.subr.bf16.mxu1 %v2314_v2  ;;  %v1965_v17 = vpack.c.bf16 %v68_v16, %v67_v15  ;;  %v69_v18 = vld [vmem:[%s2974_s1 + $0x50] sm:$0xff]  ;;  %v70_v19 = vld [vmem:[%s2974_s1 + $0x58] sm:$0xff]  ;;  %v71_v21 = vld [vmem:[%s2974_s1 + $0x60] sm:$0xff] }
   0x6   :  { %1639 = vmatprep.mubr.msk.f32.mxu0 %vm98_vm0, %v89_v12  ;;  %1642 = vmatprep.mubr.msk.f32.mxu1 %vm98_vm0, %v95_v13  ;;  %v1968_v20 = vpack.c.bf16 %v70_v19, %v69_v18  ;;  %v72_v22 = vld [vmem:[%s2974_s1 + $0x68] sm:$0xff]  ;;  %v73_v24 = vld [vmem:[%s2974_s1 + $0x70] sm:$0xff]  ;;  %v74_v25 = vld [vmem:[%s2974_s1 + $0x78] sm:$0xff]  ;;  %v30_v19 = vlaneseq }
   0x7   :  { %v1971_v23 = vpack.c.bf16 %v72_v22, %v71_v21  ;;  %v1974_v26 = vpack.c.bf16 %v74_v25, %v73_v24  ;;  %v75_v27 = vld [vmem:[%s2974_s1 + $0x80] sm:$0xff]  ;;  %v76_v28 = vld [vmem:[%s2974_s1 + $0x88] sm:$0xff]  ;;  %v77_v30 = vld [vmem:[%s2974_s1 + $0x90] sm:$0xff] }
   0x8   :  { %1957 = vmatpush1.bf16.msra.mxu0 %v1956_v6  ;;  %2069 = vmatpush1.bf16.msra.mxu1 %v1956_v6  ;;  %v1977_v29 = vpack.c.bf16 %v76_v28, %v75_v27  ;;  %v78_v31 = vld [vmem:[%s2974_s1 + $0x98] sm:$0xff]  ;;  %v79_v33 = vld [vmem:[%s2974_s1 + $0xa0] sm:$0xff]  ;;  %v80_v34 = vld [vmem:[%s2974_s1 + $0xa8] sm:$0xff]  ;;  %v37_v21 = vand.u32 127, %v30_v19 }
   0x9   :  { %1958 = vmatprep.subr.bf16.mxu0 %v2314_v2  ;;  %2058 = vmatprep.subr.bf16.mxu1 %v2314_v2  ;;  %v1980_v32 = vpack.c.bf16 %v78_v31, %v77_v30  ;;  %v1983_v35 = vpack.c.bf16 %v80_v34, %v79_v33  ;;  %v81_v36 = vld [vmem:[%s2974_s1 + $0xb0] sm:$0xff]  ;;  %v82_v37 = vld [vmem:[%s2974_s1 + $0xb8] sm:$0xff]  ;;  %v88_v39 = vld [vmem:[%s2973_s0] sm:$0xff] }
   0xa   :  { %v1986_v38 = vpack.c.bf16 %v82_v37, %v81_v36  ;;  %v94_v40 = vld [vmem:[%s2973_s0 + $0x30] sm:$0xff]  ;;  %v91_v41 = vld [vmem:[%s2973_s0 + $0x18] sm:$0xff]  ;;  %v97_v42 = vld [vmem:[%s2973_s0 + $0x48] sm:$0x3]  ;;  %vm43_vm3 = vcmp.lt.s32.totalorder %v37_v21, 17 }
   0xb   :  { %v90_v43 = vld [vmem:[%s2973_s0 + $0x10] sm:$0xff]  ;;  %v96_v44 = vld [vmem:[%s2973_s0 + $0x40] sm:$0x3]  ;;  %v93_v45 = vld [vmem:[%s2973_s0 + $0x28] sm:$0xff] }
   0xc   :  { %1960 = vmatpush1.bf16.msra.mxu0 %v1959_v9  ;;  %2070 = vmatpush1.bf16.msra.mxu1 %v1959_v9  ;;  %v92_v46 = vld [vmem:[%s2973_s0 + $0x20] sm:$0xff]  ;;  %v86_v48 = vld [vmem:[%s2974_s1 + $0xd8] sm:$0xff]  ;;  %v84_v55 = vld [vmem:[%s2974_s1 + $0xc8] sm:$0xff] }
   0xd   :  { %1961 = vmatprep.subr.bf16.mxu0 %v2314_v2  ;;  %2059 = vmatprep.subr.bf16.mxu1 %v2314_v2  ;;  %v83_v47 = vld [vmem:[%s2974_s1 + $0xc0] sm:$0xff]  ;;  %v85_v3 = vld [vmem:[%s2974_s1 + $0xd0] sm:$0xff]  ;;  %vm44_vm5 = vmxor %vm2315_vm4, %vm43_vm3 }
   0xe   :  { %v87_v56 = vld [vmem:[%s2974_s1 + $0xe0] sm:$0x3]  ;;  %vm49_vm7 = vmxor %vm44_vm5, %vm2315_vm4 }
   0xf   :  { %vm52_vm10 = vmxor %vm43_vm3, %vm2315_vm4 }
  0x10   :  { %1963 = vmatpush1.bf16.msra.mxu0 %v1962_v14  ;;  %2071 = vmatpush1.bf16.msra.mxu1 %v1962_v14 }
  0x11   :  { %1964 = vmatprep.subr.bf16.mxu0 %v2314_v2  ;;  %2060 = vmatprep.subr.bf16.mxu1 %v2314_v2 }
  0x14   :  { %1966 = vmatpush1.bf16.msra.mxu0 %v1965_v17  ;;  %2072 = vmatpush1.bf16.msra.mxu1 %v1965_v17 }
  0x15   :  { %1967 = vmatprep.subr.bf16.mxu0 %v2314_v2  ;;  %2061 = vmatprep.subr.bf16.mxu1 %v2314_v2 }
  0x18   :  { %1969 = vmatpush1.bf16.msra.mxu0 %v1968_v20  ;;  %2073 = vmatpush1.bf16.msra.mxu1 %v1968_v20  ;;  %v2552_v20 = vshrl.u32 %v30_v19, 7 }
  0x19   :  { %1970 = vmatprep.subr.bf16.mxu0 %v2314_v2  ;;  %2062 = vmatprep.subr.bf16.mxu1 %v2314_v2 }
  0x1a   :  { %v33_v22 = vadd.s32 16, %v2552_v20 }
  0x1c   :  { %1972 = vmatpush1.bf16.msra.mxu0 %v1971_v23  ;;  %2074 = vmatpush1.bf16.msra.mxu1 %v1971_v23  ;;  %vm40_vm6 = vcmp.lt.s32.totalorder %v33_v22, 17  ;;  %v2316_v23 = vmov -1e+30  }
  0x1d   :  { %1973 = vmatprep.subr.bf16.mxu0 %v2314_v2  ;;  %2063 = vmatprep.subr.bf16.mxu1 %v2314_v2  ;;  %vm46_vm8 = vmxor %vm40_vm6, %vm43_vm3  ;;  %v2555_v24 = vsel %vm49_vm7, 0.0, %v2316_v23 }
  0x1e   :  { %vm51_vm9 = vmxor %vm46_vm8, %vm2315_vm4 }
  0x1f   :  { %v2557_v25 = vsel %vm51_vm9, 0.0, %v2316_v23 }
  0x20   :  { %1975 = vmatpush1.bf16.msra.mxu0 %v1974_v26  ;;  %2075 = vmatpush1.bf16.msra.mxu1 %v1974_v26  ;;  %v2559_v26 = vsel %vm52_vm10, 0.0, %v2316_v23 }
  0x21   :  { %1976 = vmatprep.subr.bf16.mxu0 %v2314_v2  ;;  %2064 = vmatprep.subr.bf16.mxu1 %v2314_v2 }
  0x24   :  { %1978 = vmatpush1.bf16.msra.mxu0 %v1977_v29  ;;  %2076 = vmatpush1.bf16.msra.mxu1 %v1977_v29 }
  0x25   :  { %1979 = vmatprep.subr.bf16.mxu0 %v2314_v2  ;;  %2065 = vmatprep.subr.bf16.mxu1 %v2314_v2 }
  0x28   :  { %1981 = vmatpush1.bf16.msra.mxu0 %v1980_v32  ;;  %2077 = vmatpush1.bf16.msra.mxu1 %v1980_v32 }
  0x29   :  { %1982 = vmatprep.subr.bf16.mxu0 %v2314_v2  ;;  %2066 = vmatprep.subr.bf16.mxu1 %v2314_v2 }
  0x2c   :  { %1984 = vmatpush1.bf16.msra.mxu0 %v1983_v35  ;;  %2078 = vmatpush1.bf16.msra.mxu1 %v1983_v35 }
  0x2d   :  { %1985 = vmatprep.subr.bf16.mxu0 %v2314_v2  ;;  %2067 = vmatprep.subr.bf16.mxu1 %v2314_v2 }
  0x30   :  { %1987 = vmatpush1.bf16.msra.mxu0 %v1986_v38  ;;  %2079 = vmatpush1.bf16.msra.mxu1 %v1986_v38 }
  0x33   :  { %179 = vmatmul.mubr.f32.vlgmr.msra.gmra.mrb[0].mxu0 %v88_v39  ;;  %194 = vmatmul.mubr.f32.vlgmr.msra.gmra.mrb[0].mxu1 %v94_v40 }
  0x34   :  { %1640 = vmatprep.mubr.msk.f32.mxu0 %vm98_vm0, %v91_v41  ;;  %1643 = vmatprep.mubr.msk.f32.mxu1 %vm98_vm0, %v97_v42 }
  0x37   :  { %184 = vmatmul.mubr.f32.gmra.mrb[2].mxu0 %v90_v43  ;;  %199 = vmatmul.mubr.f32.gmra.mrb[2].mxu1 %v96_v44 }
  0x38   :  { %1641 = vmatprep.mubr.msk.f32.mxu0 %vm98_vm0, %v93_v45 }
  0x3b   :  { %189 = vmatmul.mubr.f32.gmra.mrb[4].mxu0 %v92_v46 }
 0x106   :  { %v180_v49 = vpop.f32.mrb[0].mxu0  ;;  %v195_v50 = vpop.f32.mrb[0].mxu1 }
 0x107   :  { %v2508_v51 = vadd.f32 %v180_v49, %v83_v47  ;;  %v2510_v52 = vadd.f32 %v195_v50, %v86_v48  ;;  %v182_v53 = vpop.f32.mrb[1].mxu0  ;;  %v197_v54 = vpop.f32.mrb[1].mxu1 }
 0x108   :  { %v204_v53 = vld [vmem:[%s2974_s1 + $0xe8] sm:$0x3]  ;;  %v2565_v54 = vsub.s32 0, %v2552_v20 }
 0x109   :  { %v215_v57 = vsel %vm205_vm1, %v2510_v52, 0.0  ;;  %v206_v58 = vsel %vm205_vm1, %v2508_v51, 0.0  ;;  %v227_v59 = vmul.f32 %v2508_v51, %v2508_v51  ;;  %v230_v16 = vmul.f32 %v2510_v52, %v2510_v52 }
 0x10a   :  { %216 = vadd.xlane.f32.xlu1 %v215_v57  ;;  %v185_v60 = vpop.f32.mrb[2].mxu0  ;;  %207 = vadd.xlane.f32.xlu0 %v206_v58  ;;  %v200_v61 = vpop.f32.mrb[2].mxu1 }
 0x10b   :  { %v2524_v62 = vadd.f32 %v185_v60, %v84_v55  ;;  %v187_v63 = vpop.f32.mrb[3].mxu0  ;;  %v2526_v0 = vadd.f32 %v200_v61, %v87_v56  ;;  %v202_v1 = vpop.f32.mrb[3].mxu1  ;;  %v232_v4 = vsel %vm205_vm1, %v227_v59, 0.0  ;;  %v241_v18 = vsel %vm205_vm1, %v230_v16, 0.0 }
 0x10c   :  { %v2568_v63 = vsub.s32 1, %v2552_v20 }
 0x10d   :  { %v209_v5 = vsel %vm205_vm1, %v2524_v62, 0.0  ;;  %v219_v9 = vsel %vm218_vm2, %v2526_v0, 0.0  ;;  %v228_v12 = vmul.f32 %v2524_v62, %v2524_v62  ;;  %v231_v15 = vmul.f32 %v2526_v0, %v2526_v0 }
 0x10e   :  { %v190_v6 = vpop.f32.mrb[4].mxu0  ;;  %233 = vadd.xlane.f32.xlu1 %v232_v4  ;;  %210 = vadd.xlane.f32.xlu0 %v209_v5  ;;  %v285_v5 = vrot.slane %v204_v53, %v2565_v54 }
 0x10f   :  { %v2534_v7 = vadd.f32 %v190_v6, %v85_v3  ;;  %v192_v8 = vpop.f32.mrb[5].mxu0  ;;  %v235_v14 = vsel %vm205_vm1, %v228_v12, 0.0  ;;  %v244_v17 = vsel %vm218_vm2, %v231_v15, 0.0 }
 0x111   :  { %v212_v10 = vsel %vm205_vm1, %v2534_v7, 0.0  ;;  %v229_v11 = vmul.f32 %v2534_v7, %v2534_v7 }
 0x112   :  { %213 = vadd.xlane.f32.xlu1 %v212_v10  ;;  %220 = vadd.xlane.f32.xlu0 %v219_v9 }
 0x113   :  { %v238_v13 = vsel %vm205_vm1, %v229_v11, 0.0  ;;  %v294_v11 = vrot.slane %v204_v53, %v2568_v63 }
 0x116   :  { %239 = vadd.xlane.f32.xlu1 %v238_v13  ;;  %236 = vadd.xlane.f32.xlu0 %v235_v14 }
 0x11a   :  { %245 = vadd.xlane.f32.xlu1 %v244_v17  ;;  %242 = vadd.xlane.f32.xlu0 %v241_v18 }
 0x197   :  { %v217_v27 = vpop.xlane.xlu1 %216  ;;  %v208_v28 = vpop.xlane.xlu0 %207 }
 0x198   :  { %v222_v29 = vmul.f32 0.03125, %v208_v28  ;;  %v225_v40 = vmul.f32 0.03125, %v217_v27 }
 0x19a   :  { %v252_v32 = vmul.f32 %v222_v29, %v222_v29  ;;  %v255_v50 = vmul.f32 %v225_v40, %v225_v40  ;;  %v262_v4 = vsub.f32 %v2508_v51, %v222_v29  ;;  %v265_v23 = vsub.f32 %v2510_v52, %v225_v40 }
 0x19b   :  { %v234_v30 = vpop.xlane.xlu1 %233  ;;  %v211_v31 = vpop.xlane.xlu0 %210 }
 0x19c   :  { %v247_v33 = vmul.f32 0.03125, %v234_v30  ;;  %v223_v38 = vmul.f32 0.03125, %v211_v31 }
 0x19e   :  { %v257_v34 = vsub.f32 %v247_v33, %v252_v32  ;;  %v253_v44 = vmul.f32 %v223_v38, %v223_v38  ;;  %v263_v16 = vsub.f32 %v2524_v62, %v223_v38 }
 0x19f   :  { %v214_v35 = vpop.xlane.xlu1 %213  ;;  %v221_v36 = vpop.xlane.xlu0 %220 }
 0x1a0   :  { %v267_v37 = vadd.f32 1e-05, %v257_v34  ;;  %v224_v39 = vmul.f32 0.03125, %v214_v35  ;;  %v226_v41 = vmul.f32 0.03125, %v221_v36 }
 0x1a2   :  { %2156 = vrsqrt.f32 %v267_v37  ;;  %v254_v45 = vmul.f32 %v224_v39, %v224_v39  ;;  %v256_v55 = vmul.f32 %v226_v41, %v226_v41  ;;  %v264_v14 = vsub.f32 %v2534_v7, %v224_v39 }
 0x1a3   :  { %v240_v42 = vpop.xlane.xlu1 %239  ;;  %v237_v43 = vpop.xlane.xlu0 %236  ;;  %v266_v19 = vsub.f32 %v2526_v0, %v226_v41 }
 0x1a4   :  { %v249_v46 = vmul.f32 0.03125, %v240_v42  ;;  %v248_v47 = vmul.f32 0.03125, %v237_v43 }
 0x1a6   :  { %v259_v48 = vsub.f32 %v249_v46, %v254_v45  ;;  %v258_v49 = vsub.f32 %v248_v47, %v253_v44 }
 0x1a7   :  { %v246_v56 = vpop.xlane.xlu1 %245  ;;  %v243_v57 = vpop.xlane.xlu0 %242 }
 0x1a8   :  { %v269_v58 = vadd.f32 1e-05, %v259_v48  ;;  %v268_v59 = vadd.f32 1e-05, %v258_v49  ;;  %v251_v60 = vmul.f32 0.03125, %v246_v56  ;;  %v250_v61 = vmul.f32 0.03125, %v243_v57 }
 0x1aa   :  { %2158 = vrsqrt.f32 %v269_v58  ;;  %v261_v1 = vsub.f32 %v251_v60, %v256_v55  ;;  %v260_v3 = vsub.f32 %v250_v61, %v255_v50 }
 0x1ab   :  { %2160 = vrsqrt.f32 %v268_v59 }
 0x1ac   :  { %v2157_v6 = vpop.eup %2156  ;;  %v271_v8 = vadd.f32 1e-05, %v261_v1  ;;  %v270_v9 = vadd.f32 1e-05, %v260_v3 }
 0x1ad   :  { %v277_v10 = vmul.f32 %v2157_v6, %v262_v4 }
 0x1ae   :  { %2162 = vrsqrt.f32 %v271_v8 }
 0x1af   :  { %v286_v12 = vmul.f32 %v285_v5, %v277_v10  ;;  %2164 = vrsqrt.f32 %v270_v9 }
 0x1b1   :  { %v295_v13 = vadd.f32 %v294_v11, %v286_v12  }
 0x1b4   :  { %v2159_v15 = vpop.eup %2158 }
 0x1b5   :  { %v2161_v17 = vpop.eup %2160  ;;  %v279_v51 = vmul.f32 %v2159_v15, %v264_v14 }
 0x1b6   :  { %v278_v18 = vmul.f32 %v2161_v17, %v263_v16 }
 0x1b7   :  { %v288_v21 = vmul.f32 %v285_v5, %v279_v51 }
 0x1b8   :  { %v2163_v22 = vpop.eup %2162  ;;  %v287_v27 = vmul.f32 %v285_v5, %v278_v18 }
 0x1b9   :  { %v2165_v28 = vpop.eup %2164  ;;  %v297_v29 = vadd.f32 %v294_v11, %v288_v21   ;;  %v281_v30 = vmul.f32 %v2163_v22, %v266_v19 }
 0x1ba   :  { %v296_v31 = vadd.f32 %v294_v11, %v287_v27   ;;  %v280_v32 = vmul.f32 %v2165_v28, %v265_v23 }
 0x1bb   :  { %v290_v33 = vmul.f32 %v285_v5, %v281_v30 }
 0x1bc   :  { %v289_v7 = vmul.f32 %v285_v5, %v280_v32 }
 0x1bd   :  { %v299_v34 = vadd.f32 %v294_v11, %v290_v33  }
 0x1be   :  { %v298_v35 = vadd.f32 %v294_v11, %v289_v7  }
 0x1bf LB: > { %v317_v52 = vsel %vm205_vm1, %v2308_v13, 0.0  ;;  %v320_v62 = vsel %vm205_vm1, %v2304_v31, 0.0  ;;  %v337_v0 = vmul.f32 %v2308_v13, %v2308_v13  ;;  %v338_v36 = vmul.f32 %v2304_v31, %v2304_v31  ;;  %s2633_s19 = sshll.u32 %s2312_s18, 5  ;;  %s1644_s23 = sshll.u32 %s2312_s18, 3  ;;  %vm1996_vm12 = vmpackc.low %vm205_vm1, %vm205_vm1  ;;  %s2312_s18 = sphi %s2587_s18, %s305_s18   ;;  %v2308_v13 = vphi %v295_v13, %v2991_v13   ;;  %v2304_v31 = vphi %v296_v31, %v2990_v31   ;;  %v2300_v29 = vphi %v297_v29, %v2989_v29   ;;  %v2296_v35 = vphi %v298_v35, %v2988_v35   ;;  %v2292_v34 = vphi %v299_v34, %v2987_v34  }
 0x1c0   : > { %318 = vadd.xlane.f32.xlu0 %v317_v52  ;;  %321 = vadd.xlane.f32.xlu1 %v320_v62  ;;  %v339_v39 = vmul.f32 %v2300_v29, %v2300_v29  ;;  %v323_v40 = vsel %vm205_vm1, %v2300_v29, 0.0  ;;  %v340_v42 = vmul.f32 %v2296_v35, %v2296_v35  ;;  %v326_v43 = vsel %vm205_vm1, %v2296_v35, 0.0  ;;  %s411_s22 = scalar_lea.vmem %s2975_s2, %s2633_s19  ;;  %s312_s26 = scalar_lea.vmem %s2979_s6, %s1644_s23 }
 0x1c1   : > { %v342_v37 = vsel %vm205_vm1, %v337_v0, 0.0  ;;  %v345_v38 = vsel %vm205_vm1, %v338_v36, 0.0  ;;  %v341_v45 = vmul.f32 %v2292_v34, %v2292_v34  ;;  %v329_v46 = vsel %vm218_vm2, %v2292_v34, 0.0  ;;  %v412_v48 = vld [vmem:[%s411_s22] sm:$0xff]  ;;  %v413_v49 = vld [vmem:[%s411_s22 + $0x8] sm:$0xff]  ;;  %v414_v55 = vld [vmem:[%s411_s22 + $0x10] sm:$0xff]  ;;  %s829_s12 = scalar_lea.vmem %s2976_s3, %s2633_s19  ;;  %s1046_s15 = scalar_lea.vmem %s2977_s4, %s2633_s19 }
 0x1c2   : > { %v348_v41 = vsel %vm205_vm1, %v339_v39, 0.0  ;;  %v351_v44 = vsel %vm205_vm1, %v340_v42, 0.0  ;;  %v1989_v50 = vpack.c.bf16 %v413_v49, %v412_v48  ;;  %v2317_v53 = vmov 0.0|0.0   ;;  %v415_v56 = vld [vmem:[%s411_s22 + $0x18] sm:$0xff]  ;;  %v2651_v0 = vld [vmem:[%s312_s26] sm:$0x3f] }
 0x1c3   : > { %v354_v47 = vsel %vm218_vm2, %v341_v45, 0.0  ;;  %1988 = vmatprep.subr.bf16.mxu0 %v2317_v53  ;;  %2080 = vmatprep.subr.bf16.mxu1 %v2317_v53  ;;  %v1992_v57 = vpack.c.bf16 %v415_v56, %v414_v55  ;;  %vm2318_vm11 = vmmov 0   ;;  %v2319_v58 = vmov 0.0   ;;  %s1645_s27 = sshll.u32 %s2312_s18, 1  ;;  %s2320_s9 = smov 96  }
 0x1c4   : > { %343 = vadd.xlane.f32.xlu0 %v342_v37  ;;  %346 = vadd.xlane.f32.xlu1 %v345_v38  ;;  %v395_v39 = vrot.slane %v2651_v0, %v2565_v54  ;;  %v404_v45 = vrot.slane %v2651_v0, %v2568_v63  ;;  %s315_s30 = scalar_lea.vmem %s2980_s7, %s1645_s27  ;;  %vm650_vm13 = vcmask 277504   ;;  %vm663_vm14 = vcmask 271360   ;;  %s2321_s10 = smov 64  }
 0x1c5   : > { %1990 = vmatpush3.bf16.msra.mxu0 %v1989_v50  ;;  %1772 = vmatprep.mubr.msk.f32.mxu0 %vm2318_vm11, %v2319_v58  ;;  %vm736_vm15 = vcmask 1041408   ;;  %s1683_s16 = sshll.u32 %s2312_s18, 7  ;;  %s305_s18 = sadd.s32 1, %s2312_s18  }
 0x1c6   : > { %1991 = vmatprep.subr.bf16.mxu0 %v2317_v53  ;;  %1806 = vmatprep.mubr.msk.f32.mxu1 %vm2318_vm11, %v2319_v58  ;;  %s2857_s20 = scalar_lea.vmem %s2978_s5, %s1683_s16  ;;  %p302_p0 = scmp.ge.s32.totalorder %s305_s18, 12  }
 0x1c7   :  { %vm1454_vm0 = vcmask (%p302_p0), 254977   ;;  %vm1343_vm3 = vcmask (%p302_p0), 253952   ;;  %vm1325_vm4 = vcmask (%p302_p0), 1046528   ;;  %s2324_s29 = smov (%p302_p0), 1e-16   ;;  %s1598_s0 = sshll.u32 (%p302_p0), %s2981_s8, 4  ;;  %s1599_s0 = int_to_ptr.vmem [resolvable:$true] %s1598_s0 }
 0x1c8   : > { %324 = vadd.xlane.f32.xlu0 %v323_v40  ;;  %349 = vadd.xlane.f32.xlu1 %v348_v41  ;;  %s2252_s14 = scalar_lea.vmem (%p302_p0), %s1599_s0, 16  ;;  %p2257_p2 = scmp.lt.s32.totalorder (%p302_p0), %s1599_s0, %s1599_s0 }
 0x1c9   : > { %1993 = vmatpush3.bf16.msra.mxu0 %v1992_v57  ;;  %p2253_p1 = scmp.ne.s32.totalorder (%p302_p0), %s1599_s0, %s2252_s14  ;;  %p2258_p3 = scmp.lt.s32.totalorder (%p302_p0), %s2252_s14, %s2252_s14 }
 0x1ca   : > { %1994 = vmatprep.subr.bf16.mxu0 %v2317_v53 }
 0x1cb   :  { %p2259_p4 = por (%p302_p0), %p2258_p3, %p2257_p2 }
 0x1cc   : > { %327 = vadd.xlane.f32.xlu0 %v326_v43  ;;  %352 = vadd.xlane.f32.xlu1 %v351_v44 }
 0x1cd   :  { %p2260_p5 = pnand (%p302_p0), %p2259_p4, %p2253_p1 }
 0x1d0   : > { %330 = vadd.xlane.f32.xlu0 %v329_v46  ;;  %355 = vadd.xlane.f32.xlu1 %v354_v47 }
 0x24d   : > { %v319_v59 = vpop.xlane.xlu0 %318  ;;  %v322_v60 = vpop.xlane.xlu1 %321 }
 0x24e   : > { %v332_v61 = vmul.f32 0.03125, %v319_v59  ;;  %v333_v1 = vmul.f32 0.03125, %v322_v60 }
 0x250   : > { %v363_v3 = vmul.f32 %v333_v1, %v333_v1  ;;  %v362_v6 = vmul.f32 %v332_v61, %v332_v61  ;;  %v372_v38 = vsub.f32 %v2308_v13, %v332_v61  ;;  %v373_v41 = vsub.f32 %v2304_v31, %v333_v1 }
 0x251   : > { %v344_v4 = vpop.xlane.xlu0 %343  ;;  %v347_v5 = vpop.xlane.xlu1 %346 }
 0x252   : > { %v357_v8 = vmul.f32 0.03125, %v344_v4  ;;  %v358_v9 = vmul.f32 0.03125, %v347_v5 }
 0x254   : > { %v367_v10 = vsub.f32 %v357_v8, %v362_v6  ;;  %v368_v11 = vsub.f32 %v358_v9, %v363_v3 }
 0x255   : > { %v325_v12 = vpop.xlane.xlu0 %324  ;;  %v350_v14 = vpop.xlane.xlu1 %349 }
 0x256   : > { %v377_v15 = vadd.f32 1e-05, %v367_v10  ;;  %v378_v16 = vadd.f32 1e-05, %v368_v11  ;;  %v334_v17 = vmul.f32 0.03125, %v325_v12  ;;  %v359_v51 = vmul.f32 0.03125, %v350_v14 }
 0x257   : > { %v2681_v14 = vld [vmem:[%s315_s30] sm:$0x3] }
 0x258   : > { %2186 = vrsqrt.f32 %v377_v15  ;;  %v364_v18 = vmul.f32 %v334_v17, %v334_v17  ;;  %v374_v49 = vsub.f32 %v2300_v29, %v334_v17 }
 0x259   : > { %2188 = vrsqrt.f32 %v378_v16  ;;  %v328_v19 = vpop.xlane.xlu0 %327  ;;  %v353_v21 = vpop.xlane.xlu1 %352  ;;  %v419_v16 = vrot.slane %v2681_v14, %v2565_v54 }
 0x25a   : > { %v369_v22 = vsub.f32 %v359_v51, %v364_v18  ;;  %v335_v23 = vmul.f32 0.03125, %v328_v19  ;;  %v360_v27 = vmul.f32 0.03125, %v353_v21 }
 0x25c   : > { %v379_v28 = vadd.f32 1e-05, %v369_v22  ;;  %v365_v30 = vmul.f32 %v335_v23, %v335_v23  ;;  %v375_v59 = vsub.f32 %v2296_v35, %v335_v23 }
 0x25d   : > { %v331_v32 = vpop.xlane.xlu0 %330  ;;  %v356_v33 = vpop.xlane.xlu1 %355 }
 0x25e   : > { %2190 = vrsqrt.f32 %v379_v28  ;;  %v370_v7 = vsub.f32 %v360_v27, %v365_v30  ;;  %v336_v52 = vmul.f32 0.03125, %v331_v32  ;;  %v361_v62 = vmul.f32 0.03125, %v356_v33 }
 0x260   : > { %v380_v36 = vadd.f32 1e-05, %v370_v7  ;;  %v366_v37 = vmul.f32 %v336_v52, %v336_v52  ;;  %v376_v4 = vsub.f32 %v2292_v34, %v336_v52 }
 0x262   : > { %v2187_v40 = vpop.eup %2186  ;;  %2192 = vrsqrt.f32 %v380_v36  ;;  %v371_v42 = vsub.f32 %v361_v62, %v366_v37 }
 0x263   : > { %v2189_v43 = vpop.eup %2188  ;;  %v387_v44 = vmul.f32 %v2187_v40, %v372_v38 }
 0x264   : > { %v381_v46 = vadd.f32 1e-05, %v371_v42  ;;  %v388_v47 = vmul.f32 %v2189_v43, %v373_v41 }
 0x265   : > { %v396_v48 = vmul.f32 %v395_v39, %v387_v44 }
 0x266   : > { %2194 = vrsqrt.f32 %v381_v46  ;;  %v397_v55 = vmul.f32 %v395_v39, %v388_v47 }
 0x267   : > { %v405_v50 = vadd.f32 %v404_v45, %v396_v48 }
 0x268   : > { %v2191_v56 = vpop.eup %2190  ;;  %v406_v60 = vadd.f32 %v404_v45, %v397_v55 }
 0x269   : > { %1773 = vmatmul.mubr.msk.f32.vlgmr.msra.gmra.mrb[0].mxu0 %vm205_vm1, %v405_v50  ;;  %v389_v57 = vmul.f32 %v2191_v56, %v374_v49 }
 0x26a   : > { %1775 = vmatprep.mubr.msk.f32.mxu0 %vm2318_vm11, %v2319_v58 }
 0x26b   : > { %v398_v61 = vmul.f32 %v395_v39, %v389_v57 }
 0x26c   : > { %v2193_v1 = vpop.eup %2192 }
 0x26d   : > { %1776 = vmatmul.mubr.msk.f32.gmra.mrb[2].mxu0 %vm205_vm1, %v406_v60  ;;  %v390_v3 = vmul.f32 %v2193_v1, %v375_v59  ;;  %v407_v5 = vadd.f32 %v404_v45, %v398_v61 }
 0x26e   : > { %1778 = vmatprep.mubr.msk.f32.mxu0 %vm2318_vm11, %v2319_v58 }
 0x26f   : > { %v399_v6 = vmul.f32 %v395_v39, %v390_v3 }
 0x270   : > { %v2195_v8 = vpop.eup %2194 }
 0x271   : > { %1779 = vmatmul.mubr.msk.f32.gmra.mrb[4].mxu0 %vm205_vm1, %v407_v5  ;;  %v391_v9 = vmul.f32 %v2195_v8, %v376_v4  ;;  %v408_v10 = vadd.f32 %v404_v45, %v399_v6 }
 0x272   : > { %1781 = vmatprep.mubr.msk.f32.mxu0 %vm2318_vm11, %v2319_v58 }
 0x273   : > { %v400_v11 = vmul.f32 %v395_v39, %v391_v9 }
 0x275   : > { %1782 = vmatmul.mubr.msk.f32.gmra.mrb[6].mxu0 %vm205_vm1, %v408_v10  ;;  %v409_v12 = vadd.f32 %v404_v45, %v400_v11 }
 0x276   : > { %1784 = vmatprep.mubr.msk.f32.mxu0 %vm2318_vm11, %v2319_v58 }
 0x279   : > { %1785 = vmatmul.mubr.msk.f32.gmra.mrb[8].mxu0 %vm205_vm1, %v409_v12 }
 0x27a   : > { %1797 = vmatprep.mubr.msk.f32.mxu0 %vm2318_vm11, %v2319_v58 }
 0x33c   : > { %v501_v15 = vpop.f32.mrb[0].mxu0 }
 0x33d   : > { %v1774_v17 = vpop.f32.mrb[1].mxu0  ;;  %v502_v18 = vadd.f32 %v501_v15, %v419_v16 }
 0x340   : > { %v506_v51 = vpop.f32.mrb[2].mxu0 }
 0x341   : > { %v507_v19 = vadd.f32 %v506_v51, %v419_v16  ;;  %v1777_v21 = vpop.f32.mrb[3].mxu0 }
 0x343   : > { %v2685_v22 = vpack.i.bf16 %v507_v19, %v502_v18 }
 0x344   : > { %v511_v23 = vpop.f32.mrb[4].mxu0 }
 0x345   : > { %v1780_v27 = vpop.f32.mrb[5].mxu0  ;;  %2167 = vrot.lane.b32.xlu0 %v2685_v22, %s2320_s9  ;;  %v512_v30 = vadd.f32 %v511_v23, %v419_v16 }
 0x348   : > { %v516_v28 = vpop.f32.mrb[6].mxu0 }
 0x349   : > { %v517_v32 = vadd.f32 %v516_v28, %v419_v16  ;;  %v1783_v33 = vpop.f32.mrb[7].mxu0 }
 0x34b   : > { %v2688_v7 = vpack.i.bf16 %v517_v32, %v512_v30 }
 0x34c   : > { %v521_v52 = vpop.f32.mrb[8].mxu0 }
 0x34d   : > { %2172 = vrot.lane.b32.xlu1 %v2688_v7, %s2320_s9  ;;  %v1786_v62 = vpop.f32.mrb[9].mxu0  ;;  %v2691_v36 = vadd.f32 %v521_v52, %v419_v16 }
 0x351   : > { %538 = vrot.lane.b32.xlu1 %v2691_v36, %s2320_s9 }
 0x3b7   : > { %v2168_v37 = vpop.permute.xlu0 %2167 }
 0x3b8   : > { %v2170_v38 = vunpack.i.h.bf16 %v2168_v37  ;;  %v2169_v39 = vunpack.i.l.bf16 %v2168_v37 }
 0x3ba   : > { %v1995_v40 = vpack.c.bf16 %v2170_v38, %v2169_v39 }
 0x3bc   : > { %1997 = vmatpush3.bf16.xpose.msk.msra.mxu0 %vm1996_vm12, %v1995_v40  ;;  %2083 = vmatpush3.bf16.xpose.msk.msra.mxu1 %vm1996_vm12, %v1995_v40 }
 0x3bd   : > { %1998 = vmatprep.subr.bf16.mxu0 %v2317_v53  ;;  %2081 = vmatprep.subr.bf16.mxu1 %v2317_v53 }
 0x3bf   : > { %v2173_v41 = vpop.permute.xlu1 %2172 }
 0x3c0   : > { %v2175_v42 = vunpack.i.h.bf16 %v2173_v41  ;;  %v2174_v43 = vunpack.i.l.bf16 %v2173_v41 }
 0x3c2   : > { %v1999_v44 = vpack.c.bf16 %v2175_v42, %v2174_v43 }
 0x3c3   : > { %v539_v45 = vpop.permute.xlu1 %538 }
 0x3c4   : > { %2001 = vmatpush3.bf16.xpose.msk.msra.mxu0 %vm1996_vm12, %v1999_v44  ;;  %2084 = vmatpush3.bf16.xpose.msk.msra.mxu1 %vm1996_vm12, %v1999_v44 }
 0x3c5   : > { %1795 = vmatprep.subr.mxu0 %v2319_v58  ;;  %2082 = vmatprep.subr.mxu1 %v2319_v58 }
 0x3cc   : > { %1796 = vmatpush3.xpose.msk.msra.mxu0 %vm205_vm1, %v539_v45  ;;  %2085 = vmatpush3.xpose.msk.msra.mxu1 %vm205_vm1, %v539_v45 }
 0x3cd   : > { %2002 = vmatprep.subr.bf16.mxu0 %v2317_v53  ;;  %2008 = vmatprep.subr.bf16.mxu1 %v2317_v53 }
 0x3cf   : > { %1798 = vmatmul.mubr.msk.f32.vlgmr.msra.gmra.mrb[10].mxu0 %vm205_vm1, %v502_v18  ;;  %1807 = vmatmul.mubr.msk.f32.vlgmr.msra.gmra.mrb[0].mxu1 %vm205_vm1, %v517_v32 }
 0x3d0   : > { %1800 = vmatprep.mubr.msk.f32.mxu0 %vm2318_vm11, %v2319_v58  ;;  %1809 = vmatprep.mubr.msk.f32.mxu1 %vm2318_vm11, %v2319_v58 }
 0x3d3   : > { %1801 = vmatmul.mubr.msk.f32.gmra.mrb[12].mxu0 %vm205_vm1, %v507_v19  ;;  %1810 = vmatmul.mubr.msk.f32.gmra.mrb[2].mxu1 %vm205_vm1, %v2691_v36 }
 0x3d4   : > { %1803 = vmatprep.mubr.msk.f32.mxu0 %vm2318_vm11, %v2319_v58  ;;  %1845 = vmatprep.mubr.msk.f32.mxu1 %vm2318_vm11, %v2319_v58 }
 0x3d7   : > { %1804 = vmatmul.mubr.msk.f32.gmra.mrb[14].mxu0 %vm205_vm1, %v512_v30 }
 0x3d8   : > { %1822 = vmatprep.mubr.msk.f32.mxu0 %vm2318_vm11, %v2319_v58 }
 0x4a2   : > { %v626_v46 = vpop.f32.mrb[10].mxu0  ;;  %v641_v47 = vpop.f32.mrb[0].mxu1 }
 0x4a3   : > { %v627_v48 = vadd.f32 %v626_v46, %v2555_v24  ;;  %v1799_v49 = vpop.f32.mrb[11].mxu0  ;;  %v1808_v50 = vpop.f32.mrb[1].mxu1  ;;  %v642_v9 = vadd.f32 %v641_v47, %v2559_v26 }
 0x4a4   : > { %v830_v49 = vld [vmem:[%s829_s12] sm:$0xff]  ;;  %v831_v50 = vld [vmem:[%s829_s12 + $0x8] sm:$0xff] }
 0x4a5   : > { %v651_v55 = vsel %vm650_vm13, %v627_v48, -inf  ;;  %v660_v11 = vsel %vm650_vm13, %v642_v9, -inf }
 0x4a6   : > { %v646_v56 = vpop.f32.mrb[2].mxu1  ;;  %652 = vmax.xlane.f32.xlu1 %v651_v55  ;;  %v631_v57 = vpop.f32.mrb[12].mxu0  ;;  %v832_v55 = vld [vmem:[%s829_s12 + $0x10] sm:$0xff] }
 0x4a7   : > { %v647_v59 = vadd.f32 %v646_v56, %v2559_v26  ;;  %v632_v60 = vadd.f32 %v631_v57, %v2555_v24  ;;  %v1802_v61 = vpop.f32.mrb[13].mxu0  ;;  %v1811_v1 = vpop.f32.mrb[3].mxu1  ;;  %v2009_v56 = vpack.c.bf16 %v831_v50, %v830_v49  ;;  %v833_v57 = vld [vmem:[%s829_s12 + $0x18] sm:$0xff]  ;;  %v1359_v26 = vld [vmem:[%s2974_s1 + $0x108] sm:$0xff] (%p302_p0) }
 0x4a8   :  { %v1357_v24 = vld [vmem:[%s2974_s1 + $0xf8] sm:$0xff] (%p302_p0) }
 0x4a9   : > { %v664_v3 = vsel %vm663_vm14, %v647_v59, -inf  ;;  %v654_v4 = vsel %vm650_vm13, %v632_v60, -inf  ;;  %2010 = vmatpush3.bf16.msra.mxu1 %v2009_v56 }
 0x4aa   : > { %665 = vmax.xlane.f32.xlu1 %v664_v3  ;;  %655 = vmax.xlane.f32.xlu0 %v654_v4  ;;  %v636_v5 = vpop.f32.mrb[14].mxu0 }
 0x4ab   : > { %v637_v6 = vadd.f32 %v636_v5, %v2557_v25  ;;  %v1805_v8 = vpop.f32.mrb[15].mxu0  ;;  %2011 = vmatprep.subr.bf16.mxu1 %v2317_v53  ;;  %v1358_v25 = vld [vmem:[%s2974_s1 + $0x100] sm:$0xff] (%p302_p0) }
 0x4ac   :  { %v2045_v54 = vpack.c.bf16 (%p302_p0), %v1358_v25, %v1357_v24 }
 0x4ad   : > { %v657_v10 = vsel %vm650_vm13, %v637_v6, -inf }
 0x4ae   : > { %658 = vmax.xlane.f32.xlu0 %v657_v10 }
 0x4b2   : > { %661 = vmax.xlane.f32.xlu0 %v660_v11 }
 0x4bb   : > { %2177 = vrot.lane.b32.xlu1 %v2685_v22, %s2321_s10 }
 0x533   : > { %v653_v12 = vpop.xlane.xlu1 %652 }
 0x534   : > { %v667_v15 = vsub.f32 %v627_v48, %v653_v12 }
 0x536   : > { %v672_v16 = vmul.f32 1.442695, %v667_v15 }
 0x537   : > { %v666_v17 = vpop.xlane.xlu1 %665  ;;  %v656_v51 = vpop.xlane.xlu0 %655 }
 0x538   : > { %2196 = vpow2.f32 %v672_v16  ;;  %v671_v18 = vsub.f32 %v647_v59, %v666_v17  ;;  %v668_v32 = vsub.f32 %v632_v60, %v656_v51  ;;  %v2012_v59 = vpack.c.bf16 %v833_v57, %v832_v55 }
 0x53a   : > { %v680_v19 = vmul.f32 1.442695, %v671_v18  ;;  %v674_v38 = vmul.f32 1.442695, %v668_v32  ;;  %2013 = vmatpush3.bf16.msra.mxu1 %v2012_v59 }
 0x53b   : > { %v2178_v21 = vpop.permute.xlu1 %2177  ;;  %v659_v23 = vpop.xlane.xlu0 %658  ;;  %2020 = vmatprep.subr.bf16.mxu1 %v2317_v53 }
 0x53c   : > { %2198 = vpow2.f32 %v680_v19  ;;  %v2180_v27 = vunpack.i.h.bf16 %v2178_v21  ;;  %v2179_v28 = vunpack.i.l.bf16 %v2178_v21  ;;  %v669_v30 = vsub.f32 %v637_v6, %v659_v23 }
 0x53e   : > { %v2003_v33 = vpack.c.bf16 %v2180_v27, %v2179_v28  ;;  %v676_v52 = vmul.f32 1.442695, %v669_v30 }
 0x53f   : > { %v662_v62 = vpop.xlane.xlu0 %661 }
 0x540   : > { %2200 = vpow2.f32 %v676_v52  ;;  %v670_v22 = vsub.f32 %v642_v9, %v662_v62  ;;  %2004 = vmatpush3.bf16.msra.mxu0 %v2003_v33 }
 0x541   : > { %2005 = vmatprep.subr.bf16.mxu0 %v2317_v53 }
 0x542   : > { %v2197_v37 = vpop.eup %2196  ;;  %v678_v39 = vmul.f32 1.442695, %v670_v22 }
 0x543   : > { %v682_v40 = vsel %vm650_vm13, %v2197_v37, 0.0 }
 0x544   : > { %2202 = vpow2.f32 %v678_v39  ;;  %683 = vadd.xlane.f32.xlu0 %v682_v40 }
 0x545   : > { %2204 = vpow2.f32 %v674_v38 }
 0x546   : > { %v2734_v41 = vpop.eup %2198 }
 0x547   : > { %v694_v42 = vsel %vm663_vm14, %v2734_v41, 0.0 }
 0x548   : > { %695 = vadd.xlane.f32.xlu0 %v694_v42 }
 0x54a   : > { %v2201_v43 = vpop.eup %2200 }
 0x54b   : > { %v688_v44 = vsel %vm650_vm13, %v2201_v43, 0.0 }
 0x54c   : > { %689 = vadd.xlane.f32.xlu0 %v688_v44 }
 0x54e   : > { %v2203_v45 = vpop.eup %2202 }
 0x54f   : > { %v691_v46 = vsel %vm650_vm13, %v2203_v45, 0.0  ;;  %v2205_v47 = vpop.eup %2204 }
 0x550   : > { %692 = vadd.xlane.f32.xlu1 %v691_v46  ;;  %v685_v48 = vsel %vm650_vm13, %v2205_v47, 0.0 }
 0x554   : > { %686 = vadd.xlane.f32.xlu1 %v685_v48 }
 0x562   : > { %2182 = vrot.lane.b32.xlu0 %v2688_v7, %s2321_s10 }
 0x565   : > { %715 = vrot.lane.b32.xlu1 %v2691_v36, %s2321_s10 }
 0x5d1   : > { %v684_v7 = vpop.xlane.xlu0 %683 }
 0x5d2   : > { %2206 = vrcp.f32 %v684_v7 }
 0x5d5   : > { %v696_v60 = vpop.xlane.xlu0 %695 }
 0x5d9   : > { %v690_v36 = vpop.xlane.xlu0 %689 }
 0x5dc   : > { %v2207_v8 = vpop.eup %2206 }
 0x5dd   : > { %v693_v61 = vpop.xlane.xlu1 %692  ;;  %v2183_v1 = vpop.permute.xlu0 %2182  ;;  %v702_v9 = vmul.f32 %v2207_v8, %v2197_v37  ;;  %v946_v37 = vsub.s32 4, %v2552_v20 }
 0x5de   : > { %v2185_v3 = vunpack.i.h.bf16 %v2183_v1  ;;  %v2184_v4 = vunpack.i.l.bf16 %v2183_v1 }
 0x5df   : > { %v947_v38 = vrot.slane %v2651_v0, %v946_v37 }
 0x5e0   : > { %v2006_v5 = vpack.c.bf16 %v2185_v3, %v2184_v4 }
 0x5e1   : > { %v687_v6 = vpop.xlane.xlu1 %686 }
 0x5e2   : > { %2208 = vrcp.f32 %v687_v6  ;;  %2007 = vmatpush3.bf16.msra.mxu0 %v2006_v5 }
 0x5e3   : > { %1820 = vmatprep.subr.mxu0 %v2319_v58  ;;  %2210 = vrcp.f32 %v690_v36 }
 0x5e4   : > { %2212 = vrcp.f32 %v693_v61 }
 0x5e5   : > { %v716_v10 = vpop.permute.xlu1 %715  ;;  %2214 = vrcp.f32 %v696_v60 }
 0x5e6   : > { %1821 = vmatpush3.msk.msra.mxu0 %vm736_vm15, %v716_v10 }
 0x5e7   : > { %1823 = vmatmul.mubr.msk.f32.vlgmr.msra.gmra.mrb[16].mxu0 %vm650_vm13, %v702_v9  ;;  %2014 = vmatprep.subr.bf16.mxu0 %v2317_v53 }
 0x5e8   : > { %1825 = vmatprep.mubr.msk.f32.mxu0 %vm2318_vm11, %v2319_v58 }
 0x5ec   : > { %v2209_v11 = vpop.eup %2208 }
 0x5ed   : > { %v703_v12 = vmul.f32 %v2209_v11, %v2205_v47  ;;  %v2211_v15 = vpop.eup %2210 }
 0x5ee   : > { %v704_v16 = vmul.f32 %v2211_v15, %v2201_v43  ;;  %v2213_v17 = vpop.eup %2212  ;;  %v1047_v15 = vld [vmem:[%s1046_s15] sm:$0xff] }
 0x5ef   : > { %1826 = vmatmul.mubr.msk.f32.gmra.mrb[18].mxu0 %vm650_vm13, %v703_v12  ;;  %v705_v51 = vmul.f32 %v2213_v17, %v2203_v45  ;;  %v2215_v18 = vpop.eup %2214 }
 0x5f0   : > { %1828 = vmatprep.mubr.msk.f32.mxu0 %vm2318_vm11, %v2319_v58  ;;  %v706_v19 = vmul.f32 %v2215_v18, %v2734_v41  ;;  %v1050_v18 = vld [vmem:[%s1046_s15 + $0x18] sm:$0xff] }
 0x5f3   : > { %1829 = vmatmul.mubr.msk.f32.gmra.mrb[20].mxu0 %vm650_vm13, %v704_v16  ;;  %v1048_v16 = vld [vmem:[%s1046_s15 + $0x8] sm:$0xff] }
 0x5f4   : > { %1831 = vmatprep.mubr.msk.f32.mxu0 %vm2318_vm11, %v2319_v58  ;;  %v2015_v17 = vpack.c.bf16 %v1048_v16, %v1047_v15 }
 0x5f6   : > { %2016 = vmatpush3.bf16.msra.mxu0 %v2015_v17 }
 0x5f7   : > { %1832 = vmatmul.mubr.msk.f32.gmra.mrb[22].mxu0 %vm650_vm13, %v705_v51  ;;  %2017 = vmatprep.subr.bf16.mxu0 %v2317_v53  ;;  %v1049_v51 = vld [vmem:[%s1046_s15 + $0x10] sm:$0xff] }
 0x5f8   : > { %1834 = vmatprep.mubr.msk.f32.mxu0 %vm2318_vm11, %v2319_v58 }
 0x5fb   : > { %1835 = vmatmul.mubr.msk.f32.gmra.mrb[24].mxu0 %vm650_vm13, %v706_v19  ;;  %v2018_v19 = vpack.c.bf16 %v1050_v18, %v1049_v51 }
 0x5fc   : > { %1868 = vmatprep.mubr.msk.f32.mxu0 %vm2318_vm11, %v2319_v58 }
 0x5fd   : > { %2019 = vmatpush3.bf16.msra.mxu0 %v2018_v19 }
 0x5fe   :  { %2044 = vmatprep.subr.bf16.mxu0 (%p302_p0), %v2314_v2 }
 0x6ba   : > { %v805_v21 = vpop.f32.mrb[16].mxu0 }
 0x6bb   : > { %v1824_v23 = vpop.f32.mrb[17].mxu0  ;;  %1846 = vmatmul.mubr.msk.f32.vlgmr.msra.gmra.mrb[4].mxu1 %vm205_vm1, %v805_v21 }
 0x6bc   : > { %1848 = vmatprep.mubr.msk.f32.mxu1 %vm2318_vm11, %v2319_v58 }
 0x6c2   : > { %v810_v27 = vpop.f32.mrb[18].mxu0 }
 0x6c3   : > { %v1827_v28 = vpop.f32.mrb[19].mxu0  ;;  %1849 = vmatmul.mubr.msk.f32.gmra.mrb[6].mxu1 %vm205_vm1, %v810_v27 }
 0x6c4   : > { %1851 = vmatprep.mubr.msk.f32.mxu1 %vm2318_vm11, %v2319_v58 }
 0x6c6   : > { %v815_v30 = vpop.f32.mrb[20].mxu0 }
 0x6c7   : > { %v1830_v32 = vpop.f32.mrb[21].mxu0  ;;  %1852 = vmatmul.mubr.msk.f32.gmra.mrb[8].mxu1 %vm205_vm1, %v815_v30 }
 0x6c8   : > { %1854 = vmatprep.mubr.msk.f32.mxu1 %vm2318_vm11, %v2319_v58 }
 0x6ca   : > { %v820_v33 = vpop.f32.mrb[22].mxu0 }
 0x6cb   : > { %v1833_v52 = vpop.f32.mrb[23].mxu0  ;;  %1855 = vmatmul.mubr.msk.f32.gmra.mrb[10].mxu1 %vm205_vm1, %v820_v33 }
 0x6cc   : > { %1857 = vmatprep.mubr.msk.f32.mxu1 %vm2318_vm11, %v2319_v58 }
 0x6ce   : > { %v825_v62 = vpop.f32.mrb[24].mxu0 }
 0x6cf   : > { %v1836_v22 = vpop.f32.mrb[25].mxu0  ;;  %1858 = vmatmul.mubr.msk.f32.gmra.mrb[12].mxu1 %vm205_vm1, %v825_v62 }
 0x6d0   : > { %1915 = vmatprep.mubr.msk.f32.mxu1 %vm2318_vm11, %v2319_v58 }
 0x78e   : > { %v915_v39 = vpop.f32.mrb[4].mxu1 }
 0x78f   : > { %v939_v40 = vadd.f32 %v2308_v13, %v915_v39  ;;  %v1847_v41 = vpop.f32.mrb[5].mxu1 }
 0x791   : > { %v2787_v42 = vadd.f32 %v947_v38, %v939_v40 }
 0x793   : > { %v953_v43 = vsel %vm205_vm1, %v2787_v42, 0.0  ;;  %v973_v44 = vmul.f32 %v2787_v42, %v2787_v42 }
 0x794   : > { %954 = vadd.xlane.f32.xlu1 %v953_v43  ;;  %v1030_v43 = vsub.s32 2, %v2552_v20 }
 0x795   : > { %v978_v45 = vsel %vm205_vm1, %v973_v44, 0.0 }
 0x796   : > { %979 = vadd.xlane.f32.xlu0 %v978_v45  ;;  %v920_v46 = vpop.f32.mrb[6].mxu1 }
 0x797   : > { %v940_v47 = vadd.f32 %v2304_v31, %v920_v46  ;;  %v1850_v48 = vpop.f32.mrb[7].mxu1 }
 0x799   : > { %v2795_v49 = vadd.f32 %v947_v38, %v940_v47 }
 0x79a   : > { %v925_v13 = vpop.f32.mrb[8].mxu1 }
 0x79b   : > { %v941_v50 = vadd.f32 %v2300_v29, %v925_v13  ;;  %v1853_v55 = vpop.f32.mrb[9].mxu1  ;;  %v956_v56 = vsel %vm205_vm1, %v2795_v49, 0.0  ;;  %v974_v57 = vmul.f32 %v2795_v49, %v2795_v49  ;;  %v1039_v13 = vsub.s32 3, %v2552_v20 }
 0x79c   : > { %957 = vadd.xlane.f32.xlu0 %v956_v56  ;;  %v1031_v56 = vrot.slane %v2651_v0, %v1030_v43 }
 0x79d   : > { %v2802_v59 = vadd.f32 %v947_v38, %v941_v50  ;;  %v981_v7 = vsel %vm205_vm1, %v974_v57, 0.0 }
 0x79e   : > { %982 = vadd.xlane.f32.xlu1 %v981_v7  ;;  %v930_v31 = vpop.f32.mrb[10].mxu1 }
 0x79f   : > { %v942_v60 = vadd.f32 %v2296_v35, %v930_v31  ;;  %v1856_v36 = vpop.f32.mrb[11].mxu1  ;;  %v959_v29 = vsel %vm205_vm1, %v2802_v59, 0.0  ;;  %v975_v61 = vmul.f32 %v2802_v59, %v2802_v59 }
 0x7a0   : > { %960 = vadd.xlane.f32.xlu0 %v959_v29 }
 0x7a1   : > { %v2810_v1 = vadd.f32 %v947_v38, %v942_v60  ;;  %v984_v3 = vsel %vm205_vm1, %v975_v61, 0.0 }
 0x7a2   : > { %985 = vadd.xlane.f32.xlu1 %v984_v3  ;;  %v935_v4 = vpop.f32.mrb[12].mxu1 }
 0x7a3   : > { %v943_v5 = vadd.f32 %v2292_v34, %v935_v4  ;;  %v1859_v6 = vpop.f32.mrb[13].mxu1  ;;  %v962_v35 = vsel %vm205_vm1, %v2810_v1, 0.0  ;;  %v976_v8 = vmul.f32 %v2810_v1, %v2810_v1  ;;  %v1040_v4 = vrot.slane %v2651_v0, %v1039_v13 }
 0x7a4   : > { %963 = vadd.xlane.f32.xlu0 %v962_v35 }
 0x7a5   : > { %v2818_v9 = vadd.f32 %v947_v38, %v943_v5  ;;  %v987_v10 = vsel %vm205_vm1, %v976_v8, 0.0 }
 0x7a6   : > { %988 = vadd.xlane.f32.xlu1 %v987_v10 }
 0x7a7   : > { %v965_v11 = vsel %vm218_vm2, %v2818_v9, 0.0  ;;  %v977_v12 = vmul.f32 %v2818_v9, %v2818_v9 }
 0x7a8   : > { %966 = vadd.xlane.f32.xlu0 %v965_v11 }
 0x7a9   : > { %v990_v34 = vsel %vm218_vm2, %v977_v12, 0.0  ;;  %vm2322_vm2 = vmmov (%p302_p0), 0  }
 0x7aa   : > { %991 = vadd.xlane.f32.xlu1 %v990_v34 }
 0x821   : > { %v955_v21 = vpop.xlane.xlu1 %954 }
 0x822   : > { %v968_v23 = vmul.f32 0.03125, %v955_v21 }
 0x823   : > { %v980_v27 = vpop.xlane.xlu0 %979 }
 0x824   : > { %v998_v28 = vmul.f32 %v968_v23, %v968_v23  ;;  %v993_v30 = vmul.f32 0.03125, %v980_v27  ;;  %v1008_v57 = vsub.f32 %v2787_v42, %v968_v23 }
 0x826   : > { %v1003_v32 = vsub.f32 %v993_v30, %v998_v28 }
 0x828   : > { %v1013_v33 = vadd.f32 1e-05, %v1003_v32 }
 0x829   : > { %v958_v52 = vpop.xlane.xlu0 %957 }
 0x82a   : > { %2216 = vrsqrt.f32 %v1013_v33  ;;  %v969_v62 = vmul.f32 0.03125, %v958_v52 }
 0x82b   : > { %v983_v22 = vpop.xlane.xlu1 %982 }
 0x82c   : > { %v999_v37 = vmul.f32 %v969_v62, %v969_v62  ;;  %v994_v38 = vmul.f32 0.03125, %v983_v22  ;;  %v1009_v16 = vsub.f32 %v2795_v49, %v969_v62 }
 0x82d   : > { %v961_v39 = vpop.xlane.xlu0 %960 }
 0x82e   : > { %v1004_v40 = vsub.f32 %v994_v38, %v999_v37  ;;  %v970_v41 = vmul.f32 0.03125, %v961_v39 }
 0x82f   : > { %v986_v44 = vpop.xlane.xlu1 %985 }
 0x830   : > { %v1014_v45 = vadd.f32 1e-05, %v1004_v40  ;;  %v1000_v46 = vmul.f32 %v970_v41, %v970_v41  ;;  %v995_v47 = vmul.f32 0.03125, %v986_v44  ;;  %v1010_v19 = vsub.f32 %v2802_v59, %v970_v41  ;;  %v1202_v44 = vld [vmem:[%s2857_s20] sm:$0xff] }
 0x831   : > { %v964_v48 = vpop.xlane.xlu0 %963 }
 0x832   : > { %2218 = vrsqrt.f32 %v1014_v45  ;;  %v1005_v50 = vsub.f32 %v995_v47, %v1000_v46  ;;  %v971_v55 = vmul.f32 0.03125, %v964_v48  ;;  %v1203_v45 = vld [vmem:[%s2857_s20 + $0x8] sm:$0xff]  ;;  %v1204_v47 = vld [vmem:[%s2857_s20 + $0x10] sm:$0xff]  ;;  %v1205_v48 = vld [vmem:[%s2857_s20 + $0x18] sm:$0xff] }
 0x833   : > { %v989_v7 = vpop.xlane.xlu1 %988  ;;  %v2021_v46 = vpack.c.bf16 %v1203_v45, %v1202_v44  ;;  %v2024_v13 = vpack.c.bf16 %v1205_v48, %v1204_v47 }
 0x834   : > { %v2217_v31 = vpop.eup %2216  ;;  %v1015_v60 = vadd.f32 1e-05, %v1005_v50  ;;  %v1001_v36 = vmul.f32 %v971_v55, %v971_v55  ;;  %v996_v29 = vmul.f32 0.03125, %v989_v7  ;;  %v1011_v30 = vsub.f32 %v2810_v1, %v971_v55  ;;  %v1206_v50 = vld [vmem:[%s2857_s20 + $0x20] sm:$0xff]  ;;  %v1207_v55 = vld [vmem:[%s2857_s20 + $0x28] sm:$0xff]  ;;  %v1209_v7 = vld [vmem:[%s2857_s20 + $0x38] sm:$0xff] }
 0x835   : > { %v1023_v61 = vmul.f32 %v2217_v31, %v1008_v57  ;;  %v967_v3 = vpop.xlane.xlu0 %966  ;;  %2022 = vmatpush3.bf16.msra.mxu1 %v2021_v46  ;;  %v1208_v57 = vld [vmem:[%s2857_s20 + $0x30] sm:$0xff] }
 0x836   : > { %2220 = vrsqrt.f32 %v1015_v60  ;;  %v1006_v5 = vsub.f32 %v996_v29, %v1001_v36  ;;  %v972_v6 = vmul.f32 0.03125, %v967_v3  ;;  %2023 = vmatprep.subr.bf16.mxu1 %v2317_v53  ;;  %v2030_v31 = vpack.c.bf16 %v1209_v7, %v1208_v57  ;;  %v1210_v60 = vld [vmem:[%s2857_s20 + $0x40] sm:$0xff]  ;;  %v1211_v36 = vld [vmem:[%s2857_s20 + $0x48] sm:$0xff]  ;;  %v1213_v3 = vld [vmem:[%s2857_s20 + $0x58] sm:$0xff] }
 0x837   : > { %v992_v35 = vpop.xlane.xlu1 %991  ;;  %v1032_v8 = vmul.f32 %v1031_v56, %v1023_v61  ;;  %v2033_v29 = vpack.c.bf16 %v1211_v36, %v1210_v60  ;;  %v1212_v61 = vld [vmem:[%s2857_s20 + $0x50] sm:$0xff] }
 0x838   : > { %v1016_v10 = vadd.f32 1e-05, %v1006_v5  ;;  %v1002_v11 = vmul.f32 %v972_v6, %v972_v6  ;;  %v997_v12 = vmul.f32 0.03125, %v992_v35  ;;  %v1012_v22 = vsub.f32 %v2818_v9, %v972_v6  ;;  %v1214_v5 = vld [vmem:[%s2857_s20 + $0x60] sm:$0xff]  ;;  %v1215_v6 = vld [vmem:[%s2857_s20 + $0x68] sm:$0xff] }
 0x839   : > { %v1041_v34 = vadd.f32 %v1040_v4, %v1032_v8  ;;  %2025 = vmatpush3.bf16.msra.mxu1 %v2024_v13  ;;  %v2039_v35 = vpack.c.bf16 %v1215_v6, %v1214_v5  ;;  %v1216_v8 = vld [vmem:[%s2857_s20 + $0x70] sm:$0xff] }
 0x83a   : > { %2222 = vrsqrt.f32 %v1016_v10  ;;  %v1007_v15 = vsub.f32 %v997_v12, %v1002_v11  ;;  %2026 = vmatprep.subr.bf16.mxu1 %v2317_v53  ;;  %v1217_v10 = vld [vmem:[%s2857_s20 + $0x78] sm:$0xff]  ;;  %v1054_v12 = vrot.slane %v2681_v14, %v2568_v63  ;;  %v1360_v63 = vld [vmem:[%s2974_s1 + $0x110] sm:$0xff] (%p302_p0) }
 0x83b   : > { %1869 = vmatmul.mubr.msk.f32.vlgmr.msra.gmra.mrb[26].mxu0 %vm205_vm1, %v1041_v34  ;;  %v2042_v11 = vpack.c.bf16 %v1217_v10, %v1216_v8 }
 0x83c   : > { %v2219_v17 = vpop.eup %2218  ;;  %v1017_v51 = vadd.f32 1e-05, %v1007_v15  ;;  %1871 = vmatprep.mubr.msk.f32.mxu0 %vm2318_vm11, %v2319_v58  ;;  %2046 = vmatpush3.bf16.msra.mxu0 (%p302_p0), %v2045_v54 }
 0x83d   : > { %v1024_v18 = vmul.f32 %v2219_v17, %v1009_v16  ;;  %2047 = vmatprep.subr.bf16.mxu0 (%p302_p0), %v2314_v2 }
 0x83e   : > { %2224 = vrsqrt.f32 %v1017_v51 }
 0x83f   : > { %v1033_v21 = vmul.f32 %v1031_v56, %v1024_v18 }
 0x840   : > { %v2221_v23 = vpop.eup %2220 }
 0x841   : > { %v1042_v27 = vadd.f32 %v1040_v4, %v1033_v21  ;;  %v1025_v28 = vmul.f32 %v2221_v23, %v1010_v19 }
 0x843   : > { %1872 = vmatmul.mubr.msk.f32.gmra.mrb[28].mxu0 %vm205_vm1, %v1042_v27  ;;  %v1034_v32 = vmul.f32 %v1031_v56, %v1025_v28 }
 0x844   : > { %v2223_v33 = vpop.eup %2222  ;;  %1874 = vmatprep.mubr.msk.f32.mxu0 %vm2318_vm11, %v2319_v58 }
 0x845   : > { %v1043_v52 = vadd.f32 %v1040_v4, %v1034_v32  ;;  %v1026_v62 = vmul.f32 %v2223_v33, %v1011_v30 }
 0x847   : > { %1875 = vmatmul.mubr.msk.f32.gmra.mrb[30].mxu0 %vm205_vm1, %v1043_v52  ;;  %v1035_v37 = vmul.f32 %v1031_v56, %v1026_v62 }
 0x848   : > { %v2225_v38 = vpop.eup %2224  ;;  %1877 = vmatprep.mubr.msk.f32.mxu0 %vm2318_vm11, %v2319_v58 }
 0x849   : > { %v1044_v39 = vadd.f32 %v1040_v4, %v1035_v37  ;;  %v1027_v40 = vmul.f32 %v2225_v38, %v1012_v22 }
 0x84b   : > { %1878 = vmatmul.mubr.msk.f32.gmra.mrb[32].mxu0 %vm205_vm1, %v1044_v39  ;;  %v1036_v41 = vmul.f32 %v1031_v56, %v1027_v40  ;;  %v2027_v56 = vpack.c.bf16 %v1207_v55, %v1206_v50 }
 0x84c   : > { %1880 = vmatprep.mubr.msk.f32.mxu0 %vm2318_vm11, %v2319_v58 }
 0x84d   : > { %v1045_v43 = vadd.f32 %v1040_v4, %v1036_v41  ;;  %2028 = vmatpush3.bf16.msra.mxu1 %v2027_v56  ;;  %v2036_v4 = vpack.c.bf16 %v1213_v3, %v1212_v61 }
 0x84e   : > { %2029 = vmatprep.subr.bf16.mxu1 %v2317_v53 }
 0x84f   : > { %1881 = vmatmul.mubr.msk.f32.gmra.mrb[34].mxu0 %vm205_vm1, %v1045_v43 }
 0x851   : > { %2031 = vmatpush3.bf16.msra.mxu1 %v2030_v31 }
 0x852   : > { %2032 = vmatprep.subr.bf16.mxu1 %v2317_v53 }
 0x855   : > { %2034 = vmatpush3.bf16.msra.mxu1 %v2033_v29 }
 0x856   : > { %2035 = vmatprep.subr.bf16.mxu1 %v2317_v53 }
 0x859   : > { %2037 = vmatpush3.bf16.msra.mxu1 %v2036_v4 }
 0x85a   : > { %2038 = vmatprep.subr.bf16.mxu1 %v2317_v53 }
 0x85d   : > { %2040 = vmatpush3.bf16.msra.mxu1 %v2039_v35  ;;  %v1315_v35 = vsub.s32 5, %v2552_v20 }
 0x85e   : > { %2041 = vmatprep.subr.bf16.mxu1 %v2317_v53 }
 0x85f   : > { %v1316_v8 = vrot.slane %v2651_v0, %v1315_v35 }
 0x861   : > { %2043 = vmatpush3.bf16.msra.mxu1 %v2042_v11 }
 0x862   :  { %2050 = vmatprep.subr.bf16.mxu1 (%p302_p0), %v2314_v2 }
 0x90e   : > { %v1136_v34 = vpop.f32.mrb[26].mxu0 }
 0x90f   : > { %v1137_v15 = vadd.f32 %v1136_v34, %v1054_v12  ;;  %v1870_v16 = vpop.f32.mrb[27].mxu0 }
 0x911   : > { %v1678_v17 = vmul.f32 -1.702, %v1137_v15 }
 0x913   : > { %v1170_v51 = vmul.f32 1.442695, %v1678_v17 }
 0x915   : > { %2226 = vpow2.f32 %v1170_v51 }
 0x916   : > { %v1141_v18 = vpop.f32.mrb[28].mxu0 }
 0x917   : > { %v1142_v19 = vadd.f32 %v1141_v18, %v1054_v12  ;;  %v1873_v21 = vpop.f32.mrb[29].mxu0 }
 0x919   : > { %v1679_v23 = vmul.f32 -1.702, %v1142_v19 }
 0x91a   : > { %v1146_v27 = vpop.f32.mrb[30].mxu0 }
 0x91b   : > { %v1172_v28 = vmul.f32 1.442695, %v1679_v23  ;;  %v1147_v53 = vadd.f32 %v1146_v27, %v1054_v12  ;;  %v1876_v30 = vpop.f32.mrb[31].mxu0 }
 0x91d   : > { %2228 = vpow2.f32 %v1172_v28  ;;  %v1680_v32 = vmul.f32 -1.702, %v1147_v53 }
 0x91e   : > { %v1151_v33 = vpop.f32.mrb[32].mxu0 }
 0x91f   : > { %v2227_v52 = vpop.eup %2226  ;;  %v1174_v62 = vmul.f32 1.442695, %v1680_v32  ;;  %v1152_v14 = vadd.f32 %v1151_v33, %v1054_v12  ;;  %v1879_v22 = vpop.f32.mrb[33].mxu0 }
 0x920   : > { %v1180_v37 = vadd.f32 1.0, %v2227_v52  ;;  %v2323_v52 = vmov (%p302_p0), 0.0  }
 0x921   : > { %2230 = vpow2.f32 %v1174_v62  ;;  %v1681_v38 = vmul.f32 -1.702, %v1152_v14  ;;  %1938 = vmatprep.mubr.msk.f32.mxu0 (%p302_p0), %vm2322_vm2, %v2323_v52  ;;  %v2048_v62 = vpack.c.bf16 (%p302_p0), %v1360_v63, %v1359_v26 }
 0x922   : > { %2232 = vrcp.f32 %v1180_v37  ;;  %v1156_v39 = vpop.f32.mrb[34].mxu0 }
 0x923   : > { %v1176_v40 = vmul.f32 1.442695, %v1681_v38  ;;  %v1157_v41 = vadd.f32 %v1156_v39, %v1054_v12  ;;  %v1882_v43 = vpop.f32.mrb[35].mxu0  ;;  %2049 = vmatpush3.bf16.msra.mxu0 (%p302_p0), %v2048_v62 }
 0x925   : > { %2234 = vpow2.f32 %v1176_v40  ;;  %v1682_v44 = vmul.f32 -1.702, %v1157_v41 }
 0x927   : > { %v2229_v45 = vpop.eup %2228  ;;  %v1178_v46 = vmul.f32 1.442695, %v1682_v44 }
 0x928   : > { %v1181_v47 = vadd.f32 1.0, %v2229_v45 }
 0x929   : > { %2236 = vpow2.f32 %v1178_v46 }
 0x92a   : > { %2238 = vrcp.f32 %v1181_v47 }
 0x92b   : > { %v2231_v48 = vpop.eup %2230 }
 0x92c   : > { %v2233_v13 = vpop.eup %2232  ;;  %v1182_v50 = vadd.f32 1.0, %v2231_v48 }
 0x92d   : > { %v1195_v55 = vmul.f32 %v2233_v13, %v1137_v15 }
 0x92e   : > { %2240 = vrcp.f32 %v1182_v50 }
 0x92f   : > { %v2235_v56 = vpop.eup %2234  ;;  %1916 = vmatmul.mubr.f32.vlgmr.msra.gmra.mrb[14].mxu1 %v1195_v55 }
 0x930   : > { %v1183_v57 = vadd.f32 1.0, %v2235_v56  ;;  %1918 = vmatprep.mubr.msk.f32.mxu1 %vm2318_vm11, %v2319_v58  ;;  %2052 = vmatpush3.bf16.msra.mxu1 (%p302_p0), %v2045_v54 }
 0x931   :  { %2053 = vmatprep.subr.bf16.mxu1 (%p302_p0), %v2314_v2  ;;  %v1356_v2 = vld [vmem:[%s2974_s1 + $0xf0] sm:$0x3] (%p302_p0) }
 0x932   : > { %2242 = vrcp.f32 %v1183_v57  ;;  %v1470_v55 = vrot.slane (%p302_p0), %v1356_v2, 7 }
 0x933   : > { %v2237_v7 = vpop.eup %2236 }
 0x934   : > { %v2239_v31 = vpop.eup %2238  ;;  %v1184_v60 = vadd.f32 1.0, %v2237_v7  ;;  %2055 = vmatpush3.bf16.msra.mxu1 (%p302_p0), %v2048_v62 }
 0x935   : > { %v1196_v36 = vmul.f32 %v2239_v31, %v1142_v19 }
 0x936   : > { %2244 = vrcp.f32 %v1184_v60 }
 0x937   : > { %1919 = vmatmul.mubr.f32.gmra.mrb[16].mxu1 %v1196_v36 }
 0x938   : > { %v2241_v29 = vpop.eup %2240  ;;  %1921 = vmatprep.mubr.msk.f32.mxu1 %vm2318_vm11, %v2319_v58 }
 0x939   : > { %v1197_v61 = vmul.f32 %v2241_v29, %v1147_v53 }
 0x93b   : > { %1922 = vmatmul.mubr.f32.gmra.mrb[18].mxu1 %v1197_v61  ;;  %v1378_v61 = vrot.slane (%p302_p0), %v1356_v2, 1 }
 0x93c   : > { %v2243_v3 = vpop.eup %2242  ;;  %1924 = vmatprep.mubr.msk.f32.mxu1 %vm2318_vm11, %v2319_v58 }
 0x93d   : > { %v1198_v4 = vmul.f32 %v2243_v3, %v1152_v14 }
 0x93f   : > { %1925 = vmatmul.mubr.f32.gmra.mrb[20].mxu1 %v1198_v4 }
 0x940   : > { %v2245_v5 = vpop.eup %2244  ;;  %1927 = vmatprep.mubr.msk.f32.mxu1 %vm2318_vm11, %v2319_v58 }
 0x941   : > { %v1199_v6 = vmul.f32 %v2245_v5, %v1157_v41 }
 0x943   : > { %1928 = vmatmul.mubr.f32.gmra.mrb[22].mxu1 %v1199_v6 }
 0x944   :  { %1949 = vmatprep.mubr.msk.f32.mxu1 (%p302_p0), %vm2322_vm2, %v2323_v52 }
 0xa02   : > { %v1284_v10 = vpop.f32.mrb[14].mxu1 }
 0xa03   : > { %v1308_v11 = vadd.f32 %v1284_v10, %v2787_v42  ;;  %v1917_v12 = vpop.f32.mrb[15].mxu1 }
 0xa05   : > { %v2895_v13 = vadd.f32 %v1316_v8, %v1308_v11  }
 0xa07   : > { %v2982_v15 = vmov %v2895_v13 }
 0xa08   : > { %v2991_v13 = vmov %v2982_v15  ;;  %v1361_v33 = vsel (%p302_p0), %vm1343_vm3, %v2982_v15, 0.0 }
 0xa0a   : > { %v1289_v34 = vpop.f32.mrb[16].mxu1 }
 0xa0b   : > { %v1309_v16 = vadd.f32 %v1289_v34, %v2795_v49  ;;  %v1920_v17 = vpop.f32.mrb[17].mxu1 }
 0xa0d   : > { %v2898_v31 = vadd.f32 %v1316_v8, %v1309_v16  }
 0xa0e   : > { %v1294_v18 = vpop.f32.mrb[18].mxu1 }
 0xa0f   : > { %v2983_v51 = vmov %v2898_v31  ;;  %v1310_v58 = vadd.f32 %v1294_v18, %v2802_v59  ;;  %v1923_v19 = vpop.f32.mrb[19].mxu1 }
 0xa10   : > { %v2990_v31 = vmov %v2983_v51 }
 0xa11   : > { %v2901_v29 = vadd.f32 %v1316_v8, %v1310_v58  }
 0xa12   : > { %v1299_v23 = vpop.f32.mrb[20].mxu1 }
 0xa13   : > { %v2984_v21 = vmov %v2901_v29  ;;  %v1311_v0 = vadd.f32 %v1299_v23, %v2810_v1  ;;  %v1926_v27 = vpop.f32.mrb[21].mxu1  ;;  %v1365_v1 = vmul.f32 (%p302_p0), %v2982_v15, %v2982_v15 }
 0xa14   : > { %v2989_v29 = vmov %v2984_v21  ;;  %v1459_v59 = vmul.f32 (%p302_p0), %v2984_v21, %v2984_v21  ;;  %v1326_v6 = vrot.slane (%p302_p0), %v2984_v21, 1 }
 0xa15   : > { %v2904_v35 = vadd.f32 %v1316_v8, %v1311_v0   ;;  %v1366_v20 = vsel (%p302_p0), %vm1343_vm3, %v1365_v1, 0.0 }
 0xa16   : > { %v1304_v28 = vpop.f32.mrb[22].mxu1  ;;  %304 = sbr.rel (!%p302_p0) target bundleno = 447 (0x1bf), region = 67  ;;  %v1460_v32 = vsel (%p302_p0), %vm1454_vm0, %v1459_v59, 0.0 }
 0xa17   : > { %v2985_v42 = vmov %v2904_v35  ;;  %v1312_v53 = vadd.f32 %v1304_v28, %v2818_v9  ;;  %v1929_v30 = vpop.f32.mrb[23].mxu1  ;;  %v1455_v9 = vsel (%p302_p0), %vm1454_vm0, %v2984_v21, 0.0  ;;  %1461 = vadd.xlane.f32.xlu1 (%p302_p0), %v1460_v32 }
 0xa18   : > { %v2988_v35 = vmov %v2985_v42  ;;  %1456 = vadd.xlane.f32.xlu0 (%p302_p0), %v1455_v9 }
 0xa19   : > { %v2907_v34 = vadd.f32 %v1316_v8, %v1312_v53   ;;  %v1327_v35 = vrot.slane (%p302_p0), %v2985_v42, 1 }
 0xa1b   : > { %v2986_v49 = vmov %v2907_v34  ;;  %1367 = vadd.xlane.f32.xlu1 (%p302_p0), %v1366_v20  ;;  %v1328_v10 = vsel (%p302_p0), %vm1325_vm4, %v1326_v6, %v1327_v35 }
 0xa1c   : > { %v2987_v34 = vmov %v2986_v49  ;;  %1362 = vadd.xlane.f32.xlu0 (%p302_p0), %v1361_v33  ;;  %v1329_v8 = vrot.slane (%p302_p0), %v2986_v49, 1  ;;  %v1334_v12 = vsub.f32 (%p302_p0), %v2982_v15, %v1328_v10 }
 0xa1e   :  { %v1330_v11 = vsel %vm1325_vm4, %v1327_v35, %v1329_v8  ;;  %v1336_v16 = vsub.f32 %v2984_v21, %v1329_v8  ;;  %v1337_v17 = vmul.f32 %v1334_v12, %v1334_v12 }
 0xa1f   :  { %v1335_v34 = vsub.f32 %v2983_v51, %v1330_v11 }
 0xa20   :  { %v1339_v58 = vmul.f32 %v1336_v16, %v1336_v16  ;;  %v1340_v19 = vsel %vm205_vm1, %v1337_v17, 0.0 }
 0xa21   :  { %v1338_v18 = vmul.f32 %v1335_v34, %v1335_v34 }
 0xa22   :  { %v1344_v27 = vsel %vm1343_vm3, %v1339_v58, 0.0 }
 0xa23   :  { %v1341_v23 = vsel %vm205_vm1, %v1338_v18, 0.0 }
 0xa24   :  { %v1342_v0 = vadd.f32 %v1341_v23, %v1340_v19 }
 0xa26   :  { %v1345_v42 = vadd.f32 %v1344_v27, %v1342_v0 }
 0xa28   :  { %1346 = vadd.xlane.f32.xlu0 %v1345_v42 }
 0xaa4   :  { %v1462_v37 = vpop.xlane.xlu1 %1461 }
 0xaa5   :  { %v1457_v14 = vpop.xlane.xlu0 %1456  ;;  %v1463_v38 = vmul.f32 0.03125, %v1462_v37 }
 0xaa6   :  { %v1458_v22 = vmul.f32 0.03125, %v1457_v14 }
 0xaa8   :  { %v1464_v39 = vmul.f32 %v1458_v22, %v1458_v22  ;;  %v1368_v44 = vpop.xlane.xlu1 %1367  ;;  %v1466_v50 = vsub.f32 %v2984_v21, %v1458_v22 }
 0xaa9   :  { %v1363_v40 = vpop.xlane.xlu0 %1362  ;;  %v1369_v45 = vmul.f32 0.03125, %v1368_v44 }
 0xaaa   :  { %v1465_v41 = vsub.f32 %v1463_v38, %v1464_v39  ;;  %v1364_v43 = vmul.f32 0.03125, %v1363_v40 }
 0xaac   :  { %v1467_v46 = vadd.f32 1e-05, %v1465_v41  ;;  %v1370_v47 = vmul.f32 %v1364_v43, %v1364_v43  ;;  %v1372_v7 = vsub.f32 %v2982_v15, %v1364_v43 }
 0xaae   :  { %2246 = vrsqrt.f32 %v1467_v46  ;;  %v1371_v48 = vsub.f32 %v1369_v45, %v1370_v47 }
 0xab0   :  { %v1373_v13 = vadd.f32 1e-05, %v1371_v48 }
 0xab2   :  { %2248 = vrsqrt.f32 %v1373_v13 }
 0xab5   :  { %v1347_v32 = vpop.xlane.xlu0 %1346 }
 0xab6   :  { %v1348_v33 = vrot.slane %v1347_v32, 4 }
 0xab8   :  { %v2247_v56 = vpop.eup %2246  ;;  %v1349_v20 = vadd.f32 %v1348_v33, %v1347_v32 }
 0xab9   :  { %v1469_v57 = vmul.f32 %v2247_v56, %v1466_v50 }
 0xaba   :  { %v1350_v24 = vrot.slane %v1349_v20, 2 }
 0xabb   :  { %v1472_v31 = vmul.f32 %v1470_v55, %v1469_v57 }
 0xabc   :  { %v2249_v60 = vpop.eup %2248  ;;  %v1351_v25 = vadd.f32 %v1350_v24, %v1349_v20 }
 0xabd   :  { %v1473_v36 = vadd.f32 %v1472_v31, %v1356_v2  ;;  %v1375_v29 = vmul.f32 %v2249_v60, %v1372_v7 }
 0xabe   :  { %v1352_v26 = vrot.slane %v1351_v25, 1 }
 0xabf   :  { %v1475_v3 = vrot.slane %v1473_v36, 1  ;;  %v1376_v4 = vmul.f32 %v1375_v29, %v1356_v2 }
 0xac0   :  { %v1353_v54 = vadd.f32 %v1352_v26, %v1351_v25 }
 0xac1   :  { %1950 = vmatmul.mubr.msk.f32.vlgmr.msra.gmra.mrb[0].mxu1 %vm205_vm1, %v1475_v3  ;;  %v1380_v5 = vadd.f32 %v1378_v61, %v1376_v4 }
 0xac2   :  { %2086 = vpush %v1353_v54 }
 0xac3   :  { %1939 = vmatmul.mubr.msk.f32.vlgmr.msra.gmra.mrb[0].mxu0 %vm205_vm1, %v1380_v5 }
 0xaf3   :  { %s2087_s1 = spop %2086 }
 0xaf4   :  { %s1355_s24 = smul.f32 0.0018382353, %s2087_s1 }
 0xaf6   :  { %1588 = sst [smem:[#allocation2]] %s1355_s24 }
 0xb94   :  { %v1544_v28 = vpop.f32.mrb[0].mxu1 }
 0xb95   :  { %v1951_v53 = vpop.f32.mrb[1].mxu1  ;;  %v1570_v59 = vmul.f32 %v1544_v28, %v1544_v28 }
 0xb96   :  { %v1450_v30 = vpop.f32.mrb[0].mxu0 }
 0xb97   :  { %v1548_v15 = vmul.f32 %v1544_v28, %v1450_v30  ;;  %v1559_v49 = vmul.f32 %v1450_v30, %v1450_v30  ;;  %v1940_v51 = vpop.f32.mrb[1].mxu0  ;;  %v1571_v9 = vsel %vm1343_vm3, %v1570_v59, 0.0 }
 0xb99   :  { %v1549_v21 = vsel %vm1343_vm3, %v1548_v15, 0.0  ;;  %v1560_v1 = vsel %vm1343_vm3, %v1559_v49, 0.0 }
 0xb9a   :  { %1550 = vadd.xlane.f32.xlu1 %v1549_v21  ;;  %1561 = vadd.xlane.f32.xlu0 %v1560_v1 }
 0xb9e   :  { %1572 = vadd.xlane.f32.xlu1 %v1571_v9 }
 0xc27   :  { %v1551_v63 = vpop.xlane.xlu1 %1550  ;;  %v1562_v52 = vpop.xlane.xlu0 %1561 }
 0xc28   :  { %v1552_v62 = vrot.slane %v1551_v63, 4  ;;  %v1563_v14 = vrot.slane %v1562_v52, 4 }
 0xc2a   :  { %v1553_v22 = vadd.f32 %v1552_v62, %v1551_v63  ;;  %v1564_v37 = vadd.f32 %v1563_v14, %v1562_v52 }
 0xc2b   :  { %v1573_v38 = vpop.xlane.xlu1 %1572 }
 0xc2c   :  { %v1554_v39 = vrot.slane %v1553_v22, 2  ;;  %v1565_v40 = vrot.slane %v1564_v37, 2  ;;  %v1574_v41 = vrot.slane %v1573_v38, 4 }
 0xc2e   :  { %v1566_v43 = vadd.f32 %v1565_v40, %v1564_v37  ;;  %v1575_v44 = vadd.f32 %v1574_v41, %v1573_v38  ;;  %v1555_v45 = vadd.f32 %v1554_v39, %v1553_v22 }
 0xc30   :  { %v1576_v46 = vrot.slane %v1575_v44, 2  ;;  %v1556_v47 = vrot.slane %v1555_v45, 1  ;;  %v1567_v48 = vrot.slane %v1566_v43, 1 }
 0xc32   :  { %v1577_v13 = vadd.f32 %v1576_v46, %v1575_v44  ;;  %v1557_v2 = vadd.f32 %v1556_v47, %v1555_v45  ;;  %v1568_v50 = vadd.f32 %v1567_v48, %v1566_v43 }
 0xc34   :  { %2088 = vpush %v1557_v2  ;;  %v1578_v55 = vrot.slane %v1577_v13, 1 }
 0xc35   :  { %2090 = vpush %v1568_v50 }
 0xc36   :  { %v1579_v56 = vadd.f32 %v1578_v55, %v1577_v13 }
 0xc38   :  { %2092 = vpush %v1579_v56 }
 0xc65   :  { %s2089_s25 = spop %2088 }
 0xc66   :  { %s2091_s26 = spop %2090 }
 0xc69   :  { %s2093_s27 = spop %2092 }
 0xc6a   :  { %s1581_s28 = smul.f32 %s2093_s27, %s2091_s26 }
 0xc6c   :  { %s1582_s30 = smax.f32 %s2324_s29, %s1581_s28 }
 0xc6d   :  { %v1583_v57 = vstv %s1582_s30 }
 0xc6e   :  { %2250 = vrsqrt.f32 %v1583_v57 }
 0xc78   :  { %v2251_v7 = vpop.eup %2250 }
 0xc79   :  { %2094 = vpush %v2251_v7 }
 0xcaa   :  { %s2095_s9 = spop %2094 }
 0xcab   :  { %s1586_s12 = smul.f32 %s2095_s9, %s2089_s25 }
 0xcad   :  { %s1589_s13 = ssub.f32 1.0, %s1586_s12 }
 0xcaf   :  { %1591 = sst [smem:[#allocation2 + $0x1]] %s1589_s13 }
 0xcb0   :  { %2263 = shalt.err (!%p2260_p5)
}
 0xcb1   :  { %s2325_s15 = smov [#allocation2]  }
 0xcb2   :  { %1601 = dma.smem_to_vmem %s2325_s15, 16, %s1599_s0, [#allocation3]  }
 0xcb3   :  { %2288 = dma.done.wait [#allocation3], 16  }
 0xcb4   :  { %2289 = vsyncadd [#allocation3], 4294967280 }
 0xcb5   :  { %1605 = sfence }
 0xcb6   :  { %1606 = vsyncpa [#allocation3], 1 }

</bundles_post_ra>
